<compile_context>
chip_gen: v7x
topology: tpu7x:2x2x1
jax: 0.10.0
libtpu: 0.0.40
codegen_flags: <defaults>
</compile_context>

<pallas_src>
import jax
import jax.numpy as jnp
from jax import lax
from jax.experimental import pallas as pl
from jax.experimental.pallas import tpu as pltpu

_SUBLANE = 8    # f32 sublane tile
_LANE = 128     # lane width


def gru_encoder_kernel(x_ref, w_ih_ref, w_hh_ref, b_ih_ref, b_hh_ref,
                       h_out_ref, gi_ref):
    """Full GRU recurrence in one kernel invocation.

    x_ref     : (T*Bp, Xp)   time-major, batch-minor, zero-padded input
    w_ih_ref  : (Xp, 3*Hp)   input->gates weights (transposed, gate blocks lane-padded)
    w_hh_ref  : (Hp, 3*Hp)   hidden->gates weights (transposed, gate blocks lane-padded)
    b_ih_ref  : (1, 3*Hp)
    b_hh_ref  : (1, 3*Hp)
    h_out_ref : (Bp, Hp)     final hidden state (padded)
    gi_ref    : (T*Bp, 3*Hp) VMEM scratch holding the hoisted input projection
    """
    Bp, Hp = h_out_ref.shape
    TB = x_ref.shape[0]
    T = TB // Bp

    # ---- Hoisted input projection: one big MXU matmul, off the serial path ----
    gi_ref[...] = (
        jnp.dot(x_ref[...], w_ih_ref[...], preferred_element_type=jnp.float32)
        + b_ih_ref[...]
    )

    # Loop-invariant broadcast hoisted out of the recurrence.
    b_hh = jnp.broadcast_to(b_hh_ref[...], (Bp, 3 * Hp))

    # ---- Serial recurrence, fully unrolled (T is small & static) ----
    h = jnp.zeros((Bp, Hp), jnp.float32)
    for t in range(T):
        gi = gi_ref[pl.ds(t * Bp, Bp), :]                          # (Bp, 3*Hp)
        gh = jnp.dot(h, w_hh_ref[...],
                     preferred_element_type=jnp.float32) + b_hh    # (Bp, 3*Hp)

        # 128-aligned lane slices (each gate occupies a lane-dense Hp block).
        i_r, i_z, i_n = gi[:, :Hp], gi[:, Hp:2 * Hp], gi[:, 2 * Hp:]
        h_r, h_z, h_n = gh[:, :Hp], gh[:, Hp:2 * Hp], gh[:, 2 * Hp:]

        r = jax.nn.sigmoid(i_r + h_r)
        z = jax.nn.sigmoid(i_z + h_z)
        n = jnp.tanh(i_n + r * h_n)
        h = (1.0 - z) * n + z * h

    h_out_ref[...] = h.astype(h_out_ref.dtype)


def encoder_forward(x, w_ih, w_hh, b_ih, b_hh):
    """x: (B, T, X) float32.  Returns the final hidden state (B, H) float32."""
    B, T, X = x.shape
    H = w_hh.shape[1]           # w_hh: (3H, H)
    assert w_ih.shape == (3 * H, X)

    if T == 0:                  # reference would return the zero initial state
        return jnp.zeros((B, H), jnp.float32)

    Bp = max(_SUBLANE, -(-B // _SUBLANE) * _SUBLANE)
    Xp = max(_LANE, -(-X // _LANE) * _LANE)
    Hp = max(_LANE, -(-H // _LANE) * _LANE)

    # ---------------- wrapper-side (plain XLA) layout plumbing ----------------
    # Time-major, zero-padded input flattened to (T*Bp, Xp): row index = t*Bp + b.
    x_tm = jnp.swapaxes(jnp.asarray(x, jnp.float32), 0, 1)        # (T, B, X)
    x_pad = jnp.zeros((T, Bp, Xp), jnp.float32).at[:, :B, :X].set(x_tm)
    x_pad = x_pad.reshape(T * Bp, Xp)

    # Transpose weights to (in, 3*gates) and give each gate its own lane-padded
    # Hp-wide block (zero columns/rows/bias entries beyond the real H / in dims).
    def pad_gates_T(w, in_dim, in_pad):
        w = jnp.asarray(w, jnp.float32)                           # (3H, in_dim)
        out = jnp.zeros((in_pad, 3 * Hp), jnp.float32)
        for g in range(3):
            out = out.at[:in_dim, g * Hp:g * Hp + H].set(w[g * H:(g + 1) * H, :].T)
        return out

    def pad_bias(b):
        b = jnp.asarray(b, jnp.float32)
        out = jnp.zeros((1, 3 * Hp), jnp.float32)
        for g in range(3):
            out = out.at[0, g * Hp:g * Hp + H].set(b[g * H:(g + 1) * H])
        return out

    w_ih_t = pad_gates_T(w_ih, X, Xp)                             # (Xp, 3*Hp)
    w_hh_t = pad_gates_T(w_hh, H, Hp)                             # (Hp, 3*Hp)
    b_ih2 = pad_bias(b_ih)                                        # (1, 3*Hp)
    b_hh2 = pad_bias(b_hh)                                        # (1, 3*Hp)

    h_pad = pl.pallas_call(
        gru_encoder_kernel,
        out_shape=jax.ShapeDtypeStruct((Bp, Hp), jnp.float32),
        grid_spec=pltpu.PrefetchScalarGridSpec(
            num_scalar_prefetch=0,
            grid=(1,),
            in_specs=[
                pl.BlockSpec((T * Bp, Xp), lambda i: (0, 0)),     # x (resident)
                pl.BlockSpec((Xp, 3 * Hp), lambda i: (0, 0)),     # W_ih^T (resident)
                pl.BlockSpec((Hp, 3 * Hp), lambda i: (0, 0)),     # W_hh^T (resident)
                pl.BlockSpec((1, 3 * Hp), lambda i: (0, 0)),      # b_ih
                pl.BlockSpec((1, 3 * Hp), lambda i: (0, 0)),      # b_hh
            ],
            out_specs=pl.BlockSpec((Bp, Hp), lambda i: (0, 0)),
            scratch_shapes=[pltpu.VMEM((T * Bp, 3 * Hp), jnp.float32)],
        ),
        compiler_params=pltpu.CompilerParams(
            dimension_semantics=("arbitrary",)),
    )(x_pad, w_ih_t, w_hh_t, b_ih2, b_hh2)

    return h_pad[:B, :H]


def encoder_reference(x, w_ih, w_hh, b_ih, b_hh):
    """Pure-JAX reference of the PyTorch Encoder.forward (GRUCell loop)."""
    B, T, X = x.shape
    H = w_hh.shape[1]

    def step(h, x_t):
        gi = x_t @ w_ih.T + b_ih
        gh = h @ w_hh.T + b_hh
        i_r, i_z, i_n = gi[:, :H], gi[:, H:2 * H], gi[:, 2 * H:]
        h_r, h_z, h_n = gh[:, :H], gh[:, H:2 * H], gh[:, 2 * H:]
        r = jax.nn.sigmoid(i_r + h_r)
        z = jax.nn.sigmoid(i_z + h_z)
        n = jnp.tanh(i_n + r * h_n)
        h_new = (1.0 - z) * n + z * h
        return h_new, None

    h0 = jnp.zeros((B, H), jnp.float32)
    h_final, _ = lax.scan(step, h0, jnp.swapaxes(x, 0, 1))
    return h_final


if __name__ == "__main__":
    # Small shapes consistent with the module: batch=2, seq=8, x_dim=16, h_dim=32.
    B, T, X, H = 2, 8, 16, 32

    key = jax.random.PRNGKey(0)
    kx, k1, k2, k3, k4 = jax.random.split(key, 5)

    # Deterministic synthetic parameters (GRUCell init: U(-1/sqrt(H), 1/sqrt(H))).
    bound = 1.0 / jnp.sqrt(jnp.float32(H))
    w_ih = jax.random.uniform(k1, (3 * H, X), jnp.float32, -bound, bound)
    w_hh = jax.random.uniform(k2, (3 * H, H), jnp.float32, -bound, bound)
    b_ih = jax.random.uniform(k3, (3 * H,), jnp.float32, -bound, bound)
    b_hh = jax.random.uniform(k4, (3 * H,), jnp.float32, -bound, bound)

    x = jax.random.normal(kx, (B, T, X), jnp.float32)

    h_kernel = encoder_forward(x, w_ih, w_hh, b_ih, b_hh)
    jax.block_until_ready(h_kernel)

    h_ref = encoder_reference(x, w_ih, w_hh, b_ih, b_hh)
    assert h_kernel.shape == (B, H)
    assert jnp.allclose(h_kernel, h_ref, atol=1e-5, rtol=1e-4), (
        f"max abs err = {jnp.max(jnp.abs(h_kernel - h_ref))}")

    print("KERNEL_OK")
</pallas_src>

<mosaic_0001>
module attributes {stable_mosaic.version = 11 : i64} {
  func.func @gru_encoder_kernel(%arg0: i32, %arg1: memref<64x128xf32, #tpu.memory_space<vmem>>, %arg2: memref<128x384xf32, #tpu.memory_space<vmem>>, %arg3: memref<128x384xf32, #tpu.memory_space<vmem>>, %arg4: memref<1x384xf32, #tpu.memory_space<vmem>>, %arg5: memref<1x384xf32, #tpu.memory_space<vmem>>, %arg6: memref<8x128xf32, #tpu.memory_space<vmem>>, %arg7: memref<64x384xf32, #tpu.memory_space<vmem>>) attributes {dimension_semantics = [#tpu.dimension_semantics<arbitrary>], iteration_bounds = array<i64: 1>, scalar_prefetch = 0 : i64, scratch_operands = 1 : i64, tpu.core_type = #tpu.core_type<tc>, window_params = [{pipeline_mode = #tpu.pipeline_mode<synchronous>, transform_indices = @transform_0, window_bounds = array<i64: 64, 128>}, {pipeline_mode = #tpu.pipeline_mode<synchronous>, transform_indices = @transform_1, window_bounds = array<i64: 128, 384>}, {pipeline_mode = #tpu.pipeline_mode<synchronous>, transform_indices = @transform_2, window_bounds = array<i64: 128, 384>}, {pipeline_mode = #tpu.pipeline_mode<synchronous>, transform_indices = @transform_3, window_bounds = array<i64: 1, 384>}, {pipeline_mode = #tpu.pipeline_mode<synchronous>, transform_indices = @transform_4, window_bounds = array<i64: 1, 384>}, {pipeline_mode = #tpu.pipeline_mode<synchronous>, transform_indices = @transform_5, window_bounds = array<i64: 8, 128>}]} {
    %c0 = arith.constant 0 : index
    %c0_0 = arith.constant 0 : index
    %0 = vector.load %arg1[%c0, %c0_0] : memref<64x128xf32, #tpu.memory_space<vmem>>, vector<64x128xf32>
    %c0_1 = arith.constant 0 : index
    %c0_2 = arith.constant 0 : index
    %1 = vector.load %arg2[%c0_1, %c0_2] : memref<128x384xf32, #tpu.memory_space<vmem>>, vector<128x384xf32>
    %cst = arith.constant dense<0.000000e+00> : vector<64x384xf32>
    %2 = tpu.matmul %0, %1, %cst {dimension_numbers = #tpu.dot_dimension_numbers<[1], [0], [0], [1], [0, 0, 1, 1], [], []>} : vector<64x128xf32>, vector<128x384xf32>, vector<64x384xf32> -> vector<64x384xf32>
    %c0_3 = arith.constant 0 : index
    %c0_4 = arith.constant 0 : index
    %3 = vector.load %arg4[%c0_3, %c0_4] : memref<1x384xf32, #tpu.memory_space<vmem>>, vector<1x384xf32>
    %4 = vector.broadcast %3 : vector<1x384xf32> to vector<64x384xf32>
    %5 = arith.addf %2, %4 : vector<64x384xf32>
    %c0_5 = arith.constant 0 : index
    %c0_6 = arith.constant 0 : index
    %6 = vector.load %arg7[%c0_5, %c0_6] : memref<64x384xf32, #tpu.memory_space<vmem>>, vector<64x384xf32>
    tpu.vector_store %arg7[%c0_5, %c0_6], %5 {strides = array<i32>} : memref<64x384xf32, #tpu.memory_space<vmem>>, vector<64x384xf32>,
    %c0_7 = arith.constant 0 : index
    %c0_8 = arith.constant 0 : index
    %7 = vector.load %arg5[%c0_7, %c0_8] : memref<1x384xf32, #tpu.memory_space<vmem>>, vector<1x384xf32>
    %8 = vector.shape_cast %7 : vector<1x384xf32> to vector<1x384xf32>
    %9 = vector.broadcast %8 : vector<1x384xf32> to vector<8x384xf32>
    %cst_9 = arith.constant 0.000000e+00 : f32
    %10 = vector.broadcast %cst_9 : f32 to vector<8x128xf32>
    %c0_10 = arith.constant 0 : index
    %c0_11 = arith.constant 0 : index
    %11 = vector.load %arg7[%c0_10, %c0_11] : memref<64x384xf32, #tpu.memory_space<vmem>>, vector<8x384xf32>
    %c0_12 = arith.constant 0 : index
    %c0_13 = arith.constant 0 : index
    %12 = vector.load %arg3[%c0_12, %c0_13] : memref<128x384xf32, #tpu.memory_space<vmem>>, vector<128x384xf32>
    %cst_14 = arith.constant dense<0.000000e+00> : vector<8x384xf32>
    %13 = tpu.matmul %10, %12, %cst_14 {dimension_numbers = #tpu.dot_dimension_numbers<[1], [0], [0], [1], [0, 0, 1, 1], [], []>} : vector<8x128xf32>, vector<128x384xf32>, vector<8x384xf32> -> vector<8x384xf32>
    %14 = arith.addf %13, %9 : vector<8x384xf32>
    %15 = vector.extract_strided_slice %11 {offsets = [0, 0], sizes = [8, 128], strides = [1, 1]} : vector<8x384xf32> to vector<8x128xf32>
    %16 = vector.extract_strided_slice %11 {offsets = [0, 128], sizes = [8, 128], strides = [1, 1]} : vector<8x384xf32> to vector<8x128xf32>
    %17 = vector.extract_strided_slice %11 {offsets = [0, 256], sizes = [8, 128], strides = [1, 1]} : vector<8x384xf32> to vector<8x128xf32>
    %18 = vector.extract_strided_slice %14 {offsets = [0, 0], sizes = [8, 128], strides = [1, 1]} : vector<8x384xf32> to vector<8x128xf32>
    %19 = vector.extract_strided_slice %14 {offsets = [0, 128], sizes = [8, 128], strides = [1, 1]} : vector<8x384xf32> to vector<8x128xf32>
    %20 = vector.extract_strided_slice %14 {offsets = [0, 256], sizes = [8, 128], strides = [1, 1]} : vector<8x384xf32> to vector<8x128xf32>
    %21 = arith.addf %15, %18 : vector<8x128xf32>
    %22 = arith.negf %21 : vector<8x128xf32>
    %23 = math.exp %22 : vector<8x128xf32>
    %cst_15 = arith.constant 1.000000e+00 : f32
    %24 = vector.broadcast %cst_15 : f32 to vector<8x128xf32>
    %25 = arith.addf %24, %23 : vector<8x128xf32>
    %26 = arith.divf %24, %25 : vector<8x128xf32>
    %27 = arith.addf %16, %19 : vector<8x128xf32>
    %28 = arith.negf %27 : vector<8x128xf32>
    %29 = math.exp %28 : vector<8x128xf32>
    %cst_16 = arith.constant 1.000000e+00 : f32
    %30 = vector.broadcast %cst_16 : f32 to vector<8x128xf32>
    %31 = arith.addf %30, %29 : vector<8x128xf32>
    %32 = arith.divf %30, %31 : vector<8x128xf32>
    %33 = arith.mulf %26, %20 : vector<8x128xf32>
    %34 = arith.addf %17, %33 : vector<8x128xf32>
    %35 = math.tanh %34 : vector<8x128xf32>
    %cst_17 = arith.constant 1.000000e+00 : f32
    %36 = vector.broadcast %cst_17 : f32 to vector<8x128xf32>
    %37 = arith.subf %36, %32 : vector<8x128xf32>
    %38 = arith.mulf %37, %35 : vector<8x128xf32>
    %39 = arith.mulf %32, %10 : vector<8x128xf32>
    %40 = arith.addf %38, %39 : vector<8x128xf32>
    %c8 = arith.constant 8 : index
    %c0_18 = arith.constant 0 : index
    %41 = vector.load %arg7[%c8, %c0_18] : memref<64x384xf32, #tpu.memory_space<vmem>>, vector<8x384xf32>
    %c0_19 = arith.constant 0 : index
    %c0_20 = arith.constant 0 : index
    %42 = vector.load %arg3[%c0_19, %c0_20] : memref<128x384xf32, #tpu.memory_space<vmem>>, vector<128x384xf32>
    %cst_21 = arith.constant dense<0.000000e+00> : vector<8x384xf32>
    %43 = tpu.matmul %40, %42, %cst_21 {dimension_numbers = #tpu.dot_dimension_numbers<[1], [0], [0], [1], [0, 0, 1, 1], [], []>} : vector<8x128xf32>, vector<128x384xf32>, vector<8x384xf32> -> vector<8x384xf32>
    %44 = arith.addf %43, %9 : vector<8x384xf32>
    %45 = vector.extract_strided_slice %41 {offsets = [0, 0], sizes = [8, 128], strides = [1, 1]} : vector<8x384xf32> to vector<8x128xf32>
    %46 = vector.extract_strided_slice %41 {offsets = [0, 128], sizes = [8, 128], strides = [1, 1]} : vector<8x384xf32> to vector<8x128xf32>
    %47 = vector.extract_strided_slice %41 {offsets = [0, 256], sizes = [8, 128], strides = [1, 1]} : vector<8x384xf32> to vector<8x128xf32>
    %48 = vector.extract_strided_slice %44 {offsets = [0, 0], sizes = [8, 128], strides = [1, 1]} : vector<8x384xf32> to vector<8x128xf32>
    %49 = vector.extract_strided_slice %44 {offsets = [0, 128], sizes = [8, 128], strides = [1, 1]} : vector<8x384xf32> to vector<8x128xf32>
    %50 = vector.extract_strided_slice %44 {offsets = [0, 256], sizes = [8, 128], strides = [1, 1]} : vector<8x384xf32> to vector<8x128xf32>
    %51 = arith.addf %45, %48 : vector<8x128xf32>
    %52 = arith.negf %51 : vector<8x128xf32>
    %53 = math.exp %52 : vector<8x128xf32>
    %cst_22 = arith.constant 1.000000e+00 : f32
    %54 = vector.broadcast %cst_22 : f32 to vector<8x128xf32>
    %55 = arith.addf %54, %53 : vector<8x128xf32>
    %56 = arith.divf %54, %55 : vector<8x128xf32>
    %57 = arith.addf %46, %49 : vector<8x128xf32>
    %58 = arith.negf %57 : vector<8x128xf32>
    %59 = math.exp %58 : vector<8x128xf32>
    %cst_23 = arith.constant 1.000000e+00 : f32
    %60 = vector.broadcast %cst_23 : f32 to vector<8x128xf32>
    %61 = arith.addf %60, %59 : vector<8x128xf32>
    %62 = arith.divf %60, %61 : vector<8x128xf32>
    %63 = arith.mulf %56, %50 : vector<8x128xf32>
    %64 = arith.addf %47, %63 : vector<8x128xf32>
    %65 = math.tanh %64 : vector<8x128xf32>
    %cst_24 = arith.constant 1.000000e+00 : f32
    %66 = vector.broadcast %cst_24 : f32 to vector<8x128xf32>
    %67 = arith.subf %66, %62 : vector<8x128xf32>
    %68 = arith.mulf %67, %65 : vector<8x128xf32>
    %69 = arith.mulf %62, %40 : vector<8x128xf32>
    %70 = arith.addf %68, %69 : vector<8x128xf32>
    %c16 = arith.constant 16 : index
    %c0_25 = arith.constant 0 : index
    %71 = vector.load %arg7[%c16, %c0_25] : memref<64x384xf32, #tpu.memory_space<vmem>>, vector<8x384xf32>
    %c0_26 = arith.constant 0 : index
    %c0_27 = arith.constant 0 : index
    %72 = vector.load %arg3[%c0_26, %c0_27] : memref<128x384xf32, #tpu.memory_space<vmem>>, vector<128x384xf32>
    %cst_28 = arith.constant dense<0.000000e+00> : vector<8x384xf32>
    %73 = tpu.matmul %70, %72, %cst_28 {dimension_numbers = #tpu.dot_dimension_numbers<[1], [0], [0], [1], [0, 0, 1, 1], [], []>} : vector<8x128xf32>, vector<128x384xf32>, vector<8x384xf32> -> vector<8x384xf32>
    %74 = arith.addf %73, %9 : vector<8x384xf32>
    %75 = vector.extract_strided_slice %71 {offsets = [0, 0], sizes = [8, 128], strides = [1, 1]} : vector<8x384xf32> to vector<8x128xf32>
    %76 = vector.extract_strided_slice %71 {offsets = [0, 128], sizes = [8, 128], strides = [1, 1]} : vector<8x384xf32> to vector<8x128xf32>
    %77 = vector.extract_strided_slice %71 {offsets = [0, 256], sizes = [8, 128], strides = [1, 1]} : vector<8x384xf32> to vector<8x128xf32>
    %78 = vector.extract_strided_slice %74 {offsets = [0, 0], sizes = [8, 128], strides = [1, 1]} : vector<8x384xf32> to vector<8x128xf32>
    %79 = vector.extract_strided_slice %74 {offsets = [0, 128], sizes = [8, 128], strides = [1, 1]} : vector<8x384xf32> to vector<8x128xf32>
    %80 = vector.extract_strided_slice %74 {offsets = [0, 256], sizes = [8, 128], strides = [1, 1]} : vector<8x384xf32> to vector<8x128xf32>
    %81 = arith.addf %75, %78 : vector<8x128xf32>
    %82 = arith.negf %81 : vector<8x128xf32>
    %83 = math.exp %82 : vector<8x128xf32>
    %cst_29 = arith.constant 1.000000e+00 : f32
    %84 = vector.broadcast %cst_29 : f32 to vector<8x128xf32>
    %85 = arith.addf %84, %83 : vector<8x128xf32>
    %86 = arith.divf %84, %85 : vector<8x128xf32>
    %87 = arith.addf %76, %79 : vector<8x128xf32>
    %88 = arith.negf %87 : vector<8x128xf32>
    %89 = math.exp %88 : vector<8x128xf32>
    %cst_30 = arith.constant 1.000000e+00 : f32
    %90 = vector.broadcast %cst_30 : f32 to vector<8x128xf32>
    %91 = arith.addf %90, %89 : vector<8x128xf32>
    %92 = arith.divf %90, %91 : vector<8x128xf32>
    %93 = arith.mulf %86, %80 : vector<8x128xf32>
    %94 = arith.addf %77, %93 : vector<8x128xf32>
    %95 = math.tanh %94 : vector<8x128xf32>
    %cst_31 = arith.constant 1.000000e+00 : f32
    %96 = vector.broadcast %cst_31 : f32 to vector<8x128xf32>
    %97 = arith.subf %96, %92 : vector<8x128xf32>
    %98 = arith.mulf %97, %95 : vector<8x128xf32>
    %99 = arith.mulf %92, %70 : vector<8x128xf32>
    %100 = arith.addf %98, %99 : vector<8x128xf32>
    %c24 = arith.constant 24 : index
    %c0_32 = arith.constant 0 : index
    %101 = vector.load %arg7[%c24, %c0_32] : memref<64x384xf32, #tpu.memory_space<vmem>>, vector<8x384xf32>
    %c0_33 = arith.constant 0 : index
    %c0_34 = arith.constant 0 : index
    %102 = vector.load %arg3[%c0_33, %c0_34] : memref<128x384xf32, #tpu.memory_space<vmem>>, vector<128x384xf32>
    %cst_35 = arith.constant dense<0.000000e+00> : vector<8x384xf32>
    %103 = tpu.matmul %100, %102, %cst_35 {dimension_numbers = #tpu.dot_dimension_numbers<[1], [0], [0], [1], [0, 0, 1, 1], [], []>} : vector<8x128xf32>, vector<128x384xf32>, vector<8x384xf32> -> vector<8x384xf32>
    %104 = arith.addf %103, %9 : vector<8x384xf32>
    %105 = vector.extract_strided_slice %101 {offsets = [0, 0], sizes = [8, 128], strides = [1, 1]} : vector<8x384xf32> to vector<8x128xf32>
    %106 = vector.extract_strided_slice %101 {offsets = [0, 128], sizes = [8, 128], strides = [1, 1]} : vector<8x384xf32> to vector<8x128xf32>
    %107 = vector.extract_strided_slice %101 {offsets = [0, 256], sizes = [8, 128], strides = [1, 1]} : vector<8x384xf32> to vector<8x128xf32>
    %108 = vector.extract_strided_slice %104 {offsets = [0, 0], sizes = [8, 128], strides = [1, 1]} : vector<8x384xf32> to vector<8x128xf32>
    %109 = vector.extract_strided_slice %104 {offsets = [0, 128], sizes = [8, 128], strides = [1, 1]} : vector<8x384xf32> to vector<8x128xf32>
    %110 = vector.extract_strided_slice %104 {offsets = [0, 256], sizes = [8, 128], strides = [1, 1]} : vector<8x384xf32> to vector<8x128xf32>
    %111 = arith.addf %105, %108 : vector<8x128xf32>
    %112 = arith.negf %111 : vector<8x128xf32>
    %113 = math.exp %112 : vector<8x128xf32>
    %cst_36 = arith.constant 1.000000e+00 : f32
    %114 = vector.broadcast %cst_36 : f32 to vector<8x128xf32>
    %115 = arith.addf %114, %113 : vector<8x128xf32>
    %116 = arith.divf %114, %115 : vector<8x128xf32>
    %117 = arith.addf %106, %109 : vector<8x128xf32>
    %118 = arith.negf %117 : vector<8x128xf32>
    %119 = math.exp %118 : vector<8x128xf32>
    %cst_37 = arith.constant 1.000000e+00 : f32
    %120 = vector.broadcast %cst_37 : f32 to vector<8x128xf32>
    %121 = arith.addf %120, %119 : vector<8x128xf32>
    %122 = arith.divf %120, %121 : vector<8x128xf32>
    %123 = arith.mulf %116, %110 : vector<8x128xf32>
    %124 = arith.addf %107, %123 : vector<8x128xf32>
    %125 = math.tanh %124 : vector<8x128xf32>
    %cst_38 = arith.constant 1.000000e+00 : f32
    %126 = vector.broadcast %cst_38 : f32 to vector<8x128xf32>
    %127 = arith.subf %126, %122 : vector<8x128xf32>
    %128 = arith.mulf %127, %125 : vector<8x128xf32>
    %129 = arith.mulf %122, %100 : vector<8x128xf32>
    %130 = arith.addf %128, %129 : vector<8x128xf32>
    %c32 = arith.constant 32 : index
    %c0_39 = arith.constant 0 : index
    %131 = vector.load %arg7[%c32, %c0_39] : memref<64x384xf32, #tpu.memory_space<vmem>>, vector<8x384xf32>
    %c0_40 = arith.constant 0 : index
    %c0_41 = arith.constant 0 : index
    %132 = vector.load %arg3[%c0_40, %c0_41] : memref<128x384xf32, #tpu.memory_space<vmem>>, vector<128x384xf32>
    %cst_42 = arith.constant dense<0.000000e+00> : vector<8x384xf32>
    %133 = tpu.matmul %130, %132, %cst_42 {dimension_numbers = #tpu.dot_dimension_numbers<[1], [0], [0], [1], [0, 0, 1, 1], [], []>} : vector<8x128xf32>, vector<128x384xf32>, vector<8x384xf32> -> vector<8x384xf32>
    %134 = arith.addf %133, %9 : vector<8x384xf32>
    %135 = vector.extract_strided_slice %131 {offsets = [0, 0], sizes = [8, 128], strides = [1, 1]} : vector<8x384xf32> to vector<8x128xf32>
    %136 = vector.extract_strided_slice %131 {offsets = [0, 128], sizes = [8, 128], strides = [1, 1]} : vector<8x384xf32> to vector<8x128xf32>
    %137 = vector.extract_strided_slice %131 {offsets = [0, 256], sizes = [8, 128], strides = [1, 1]} : vector<8x384xf32> to vector<8x128xf32>
    %138 = vector.extract_strided_slice %134 {offsets = [0, 0], sizes = [8, 128], strides = [1, 1]} : vector<8x384xf32> to vector<8x128xf32>
    %139 = vector.extract_strided_slice %134 {offsets = [0, 128], sizes = [8, 128], strides = [1, 1]} : vector<8x384xf32> to vector<8x128xf32>
    %140 = vector.extract_strided_slice %134 {offsets = [0, 256], sizes = [8, 128], strides = [1, 1]} : vector<8x384xf32> to vector<8x128xf32>
    %141 = arith.addf %135, %138 : vector<8x128xf32>
    %142 = arith.negf %141 : vector<8x128xf32>
    %143 = math.exp %142 : vector<8x128xf32>
    %cst_43 = arith.constant 1.000000e+00 : f32
    %144 = vector.broadcast %cst_43 : f32 to vector<8x128xf32>
    %145 = arith.addf %144, %143 : vector<8x128xf32>
    %146 = arith.divf %144, %145 : vector<8x128xf32>
    %147 = arith.addf %136, %139 : vector<8x128xf32>
    %148 = arith.negf %147 : vector<8x128xf32>
    %149 = math.exp %148 : vector<8x128xf32>
    %cst_44 = arith.constant 1.000000e+00 : f32
    %150 = vector.broadcast %cst_44 : f32 to vector<8x128xf32>
    %151 = arith.addf %150, %149 : vector<8x128xf32>
    %152 = arith.divf %150, %151 : vector<8x128xf32>
    %153 = arith.mulf %146, %140 : vector<8x128xf32>
    %154 = arith.addf %137, %153 : vector<8x128xf32>
    %155 = math.tanh %154 : vector<8x128xf32>
    %cst_45 = arith.constant 1.000000e+00 : f32
    %156 = vector.broadcast %cst_45 : f32 to vector<8x128xf32>
    %157 = arith.subf %156, %152 : vector<8x128xf32>
    %158 = arith.mulf %157, %155 : vector<8x128xf32>
    %159 = arith.mulf %152, %130 : vector<8x128xf32>
    %160 = arith.addf %158, %159 : vector<8x128xf32>
    %c40 = arith.constant 40 : index
    %c0_46 = arith.constant 0 : index
    %161 = vector.load %arg7[%c40, %c0_46] : memref<64x384xf32, #tpu.memory_space<vmem>>, vector<8x384xf32>
    %c0_47 = arith.constant 0 : index
    %c0_48 = arith.constant 0 : index
    %162 = vector.load %arg3[%c0_47, %c0_48] : memref<128x384xf32, #tpu.memory_space<vmem>>, vector<128x384xf32>
    %cst_49 = arith.constant dense<0.000000e+00> : vector<8x384xf32>
    %163 = tpu.matmul %160, %162, %cst_49 {dimension_numbers = #tpu.dot_dimension_numbers<[1], [0], [0], [1], [0, 0, 1, 1], [], []>} : vector<8x128xf32>, vector<128x384xf32>, vector<8x384xf32> -> vector<8x384xf32>
    %164 = arith.addf %163, %9 : vector<8x384xf32>
    %165 = vector.extract_strided_slice %161 {offsets = [0, 0], sizes = [8, 128], strides = [1, 1]} : vector<8x384xf32> to vector<8x128xf32>
    %166 = vector.extract_strided_slice %161 {offsets = [0, 128], sizes = [8, 128], strides = [1, 1]} : vector<8x384xf32> to vector<8x128xf32>
    %167 = vector.extract_strided_slice %161 {offsets = [0, 256], sizes = [8, 128], strides = [1, 1]} : vector<8x384xf32> to vector<8x128xf32>
    %168 = vector.extract_strided_slice %164 {offsets = [0, 0], sizes = [8, 128], strides = [1, 1]} : vector<8x384xf32> to vector<8x128xf32>
    %169 = vector.extract_strided_slice %164 {offsets = [0, 128], sizes = [8, 128], strides = [1, 1]} : vector<8x384xf32> to vector<8x128xf32>
    %170 = vector.extract_strided_slice %164 {offsets = [0, 256], sizes = [8, 128], strides = [1, 1]} : vector<8x384xf32> to vector<8x128xf32>
    %171 = arith.addf %165, %168 : vector<8x128xf32>
    %172 = arith.negf %171 : vector<8x128xf32>
    %173 = math.exp %172 : vector<8x128xf32>
    %cst_50 = arith.constant 1.000000e+00 : f32
    %174 = vector.broadcast %cst_50 : f32 to vector<8x128xf32>
    %175 = arith.addf %174, %173 : vector<8x128xf32>
    %176 = arith.divf %174, %175 : vector<8x128xf32>
    %177 = arith.addf %166, %169 : vector<8x128xf32>
    %178 = arith.negf %177 : vector<8x128xf32>
    %179 = math.exp %178 : vector<8x128xf32>
    %cst_51 = arith.constant 1.000000e+00 : f32
    %180 = vector.broadcast %cst_51 : f32 to vector<8x128xf32>
    %181 = arith.addf %180, %179 : vector<8x128xf32>
    %182 = arith.divf %180, %181 : vector<8x128xf32>
    %183 = arith.mulf %176, %170 : vector<8x128xf32>
    %184 = arith.addf %167, %183 : vector<8x128xf32>
    %185 = math.tanh %184 : vector<8x128xf32>
    %cst_52 = arith.constant 1.000000e+00 : f32
    %186 = vector.broadcast %cst_52 : f32 to vector<8x128xf32>
    %187 = arith.subf %186, %182 : vector<8x128xf32>
    %188 = arith.mulf %187, %185 : vector<8x128xf32>
    %189 = arith.mulf %182, %160 : vector<8x128xf32>
    %190 = arith.addf %188, %189 : vector<8x128xf32>
    %c48 = arith.constant 48 : index
    %c0_53 = arith.constant 0 : index
    %191 = vector.load %arg7[%c48, %c0_53] : memref<64x384xf32, #tpu.memory_space<vmem>>, vector<8x384xf32>
    %c0_54 = arith.constant 0 : index
    %c0_55 = arith.constant 0 : index
    %192 = vector.load %arg3[%c0_54, %c0_55] : memref<128x384xf32, #tpu.memory_space<vmem>>, vector<128x384xf32>
    %cst_56 = arith.constant dense<0.000000e+00> : vector<8x384xf32>
    %193 = tpu.matmul %190, %192, %cst_56 {dimension_numbers = #tpu.dot_dimension_numbers<[1], [0], [0], [1], [0, 0, 1, 1], [], []>} : vector<8x128xf32>, vector<128x384xf32>, vector<8x384xf32> -> vector<8x384xf32>
    %194 = arith.addf %193, %9 : vector<8x384xf32>
    %195 = vector.extract_strided_slice %191 {offsets = [0, 0], sizes = [8, 128], strides = [1, 1]} : vector<8x384xf32> to vector<8x128xf32>
    %196 = vector.extract_strided_slice %191 {offsets = [0, 128], sizes = [8, 128], strides = [1, 1]} : vector<8x384xf32> to vector<8x128xf32>
    %197 = vector.extract_strided_slice %191 {offsets = [0, 256], sizes = [8, 128], strides = [1, 1]} : vector<8x384xf32> to vector<8x128xf32>
    %198 = vector.extract_strided_slice %194 {offsets = [0, 0], sizes = [8, 128], strides = [1, 1]} : vector<8x384xf32> to vector<8x128xf32>
    %199 = vector.extract_strided_slice %194 {offsets = [0, 128], sizes = [8, 128], strides = [1, 1]} : vector<8x384xf32> to vector<8x128xf32>
    %200 = vector.extract_strided_slice %194 {offsets = [0, 256], sizes = [8, 128], strides = [1, 1]} : vector<8x384xf32> to vector<8x128xf32>
    %201 = arith.addf %195, %198 : vector<8x128xf32>
    %202 = arith.negf %201 : vector<8x128xf32>
    %203 = math.exp %202 : vector<8x128xf32>
    %cst_57 = arith.constant 1.000000e+00 : f32
    %204 = vector.broadcast %cst_57 : f32 to vector<8x128xf32>
    %205 = arith.addf %204, %203 : vector<8x128xf32>
    %206 = arith.divf %204, %205 : vector<8x128xf32>
    %207 = arith.addf %196, %199 : vector<8x128xf32>
    %208 = arith.negf %207 : vector<8x128xf32>
    %209 = math.exp %208 : vector<8x128xf32>
    %cst_58 = arith.constant 1.000000e+00 : f32
    %210 = vector.broadcast %cst_58 : f32 to vector<8x128xf32>
    %211 = arith.addf %210, %209 : vector<8x128xf32>
    %212 = arith.divf %210, %211 : vector<8x128xf32>
    %213 = arith.mulf %206, %200 : vector<8x128xf32>
    %214 = arith.addf %197, %213 : vector<8x128xf32>
    %215 = math.tanh %214 : vector<8x128xf32>
    %cst_59 = arith.constant 1.000000e+00 : f32
    %216 = vector.broadcast %cst_59 : f32 to vector<8x128xf32>
    %217 = arith.subf %216, %212 : vector<8x128xf32>
    %218 = arith.mulf %217, %215 : vector<8x128xf32>
    %219 = arith.mulf %212, %190 : vector<8x128xf32>
    %220 = arith.addf %218, %219 : vector<8x128xf32>
    %c56 = arith.constant 56 : index
    %c0_60 = arith.constant 0 : index
    %221 = vector.load %arg7[%c56, %c0_60] : memref<64x384xf32, #tpu.memory_space<vmem>>, vector<8x384xf32>
    %c0_61 = arith.constant 0 : index
    %c0_62 = arith.constant 0 : index
    %222 = vector.load %arg3[%c0_61, %c0_62] : memref<128x384xf32, #tpu.memory_space<vmem>>, vector<128x384xf32>
    %cst_63 = arith.constant dense<0.000000e+00> : vector<8x384xf32>
    %223 = tpu.matmul %220, %222, %cst_63 {dimension_numbers = #tpu.dot_dimension_numbers<[1], [0], [0], [1], [0, 0, 1, 1], [], []>} : vector<8x128xf32>, vector<128x384xf32>, vector<8x384xf32> -> vector<8x384xf32>
    %224 = arith.addf %223, %9 : vector<8x384xf32>
    %225 = vector.extract_strided_slice %221 {offsets = [0, 0], sizes = [8, 128], strides = [1, 1]} : vector<8x384xf32> to vector<8x128xf32>
    %226 = vector.extract_strided_slice %221 {offsets = [0, 128], sizes = [8, 128], strides = [1, 1]} : vector<8x384xf32> to vector<8x128xf32>
    %227 = vector.extract_strided_slice %221 {offsets = [0, 256], sizes = [8, 128], strides = [1, 1]} : vector<8x384xf32> to vector<8x128xf32>
    %228 = vector.extract_strided_slice %224 {offsets = [0, 0], sizes = [8, 128], strides = [1, 1]} : vector<8x384xf32> to vector<8x128xf32>
    %229 = vector.extract_strided_slice %224 {offsets = [0, 128], sizes = [8, 128], strides = [1, 1]} : vector<8x384xf32> to vector<8x128xf32>
    %230 = vector.extract_strided_slice %224 {offsets = [0, 256], sizes = [8, 128], strides = [1, 1]} : vector<8x384xf32> to vector<8x128xf32>
    %231 = arith.addf %225, %228 : vector<8x128xf32>
    %232 = arith.negf %231 : vector<8x128xf32>
    %233 = math.exp %232 : vector<8x128xf32>
    %cst_64 = arith.constant 1.000000e+00 : f32
    %234 = vector.broadcast %cst_64 : f32 to vector<8x128xf32>
    %235 = arith.addf %234, %233 : vector<8x128xf32>
    %236 = arith.divf %234, %235 : vector<8x128xf32>
    %237 = arith.addf %226, %229 : vector<8x128xf32>
    %238 = arith.negf %237 : vector<8x128xf32>
    %239 = math.exp %238 : vector<8x128xf32>
    %cst_65 = arith.constant 1.000000e+00 : f32
    %240 = vector.broadcast %cst_65 : f32 to vector<8x128xf32>
    %241 = arith.addf %240, %239 : vector<8x128xf32>
    %242 = arith.divf %240, %241 : vector<8x128xf32>
    %243 = arith.mulf %236, %230 : vector<8x128xf32>
    %244 = arith.addf %227, %243 : vector<8x128xf32>
    %245 = math.tanh %244 : vector<8x128xf32>
    %cst_66 = arith.constant 1.000000e+00 : f32
    %246 = vector.broadcast %cst_66 : f32 to vector<8x128xf32>
    %247 = arith.subf %246, %242 : vector<8x128xf32>
    %248 = arith.mulf %247, %245 : vector<8x128xf32>
    %249 = arith.mulf %242, %220 : vector<8x128xf32>
    %250 = arith.addf %248, %249 : vector<8x128xf32>
    %c0_67 = arith.constant 0 : index
    %c0_68 = arith.constant 0 : index
    %251 = vector.load %arg6[%c0_67, %c0_68] : memref<8x128xf32, #tpu.memory_space<vmem>>, vector<8x128xf32>
    tpu.vector_store %arg6[%c0_67, %c0_68], %250 {strides = array<i32>} : memref<8x128xf32, #tpu.memory_space<vmem>>, vector<8x128xf32>,
    return
  }
  func.func @transform_0(%arg0: i32) -> (i32, i32) {
    %c0_i32 = arith.constant 0 : i32
    %c0_i32_0 = arith.constant 0 : i32
    %c0_i32_1 = arith.constant 0 : i32
    return %c0_i32, %c0_i32_0 : i32, i32
  }
  func.func @transform_1(%arg0: i32) -> (i32, i32) {
    %c0_i32 = arith.constant 0 : i32
    %c0_i32_0 = arith.constant 0 : i32
    %c0_i32_1 = arith.constant 0 : i32
    return %c0_i32, %c0_i32_0 : i32, i32
  }
  func.func @transform_2(%arg0: i32) -> (i32, i32) {
    %c0_i32 = arith.constant 0 : i32
    %c0_i32_0 = arith.constant 0 : i32
    %c0_i32_1 = arith.constant 0 : i32
    return %c0_i32, %c0_i32_0 : i32, i32
  }
  func.func @transform_3(%arg0: i32) -> (i32, i32) {
    %c0_i32 = arith.constant 0 : i32
    %c0_i32_0 = arith.constant 0 : i32
    %c0_i32_1 = arith.constant 0 : i32
    return %c0_i32, %c0_i32_0 : i32, i32
  }
  func.func @transform_4(%arg0: i32) -> (i32, i32) {
    %c0_i32 = arith.constant 0 : i32
    %c0_i32_0 = arith.constant 0 : i32
    %c0_i32_1 = arith.constant 0 : i32
    return %c0_i32, %c0_i32_0 : i32, i32
  }
  func.func @transform_5(%arg0: i32) -> (i32, i32) {
    %c0_i32 = arith.constant 0 : i32
    %c0_i32_0 = arith.constant 0 : i32
    %c0_i32_1 = arith.constant 0 : i32
    return %c0_i32, %c0_i32_0 : i32, i32
  }
}

</mosaic_0001>

<bundles_post_ra>
// kernel: tpu_custom_call.1
= control target key start
LH: loop header
LB: loop body
LE: loop exit
PB: predicated region body
PF: predicated region fallthrough
CT: control target
= control target key end

     0   :  { %10 = vsyncpa [#allocation4], 0  ;;  %s3518_s0 = inlined_call_operand.hbm [shape: f32[64,128], index: 0, kind: input, shape index: {}]   ;;  %s3519_s1 = inlined_call_operand.hbm [shape: f32[128,384], index: 1, kind: input, shape index: {}]   ;;  %s3520_s2 = inlined_call_operand.hbm [shape: f32[128,384], index: 2, kind: input, shape index: {}]   ;;  %s3521_s3 = inlined_call_operand.vmem [shape: f32[1,384], index: 3, kind: input, shape index: {}]   ;;  %s3522_s4 = inlined_call_operand.vmem [shape: f32[1,384], index: 4, kind: input, shape index: {}]   ;;  %s3523_s5 = inlined_call_operand.hbm [shape: f32[8,128], index: 5, kind: output, shape index: {}]  }
   0x1   :  { %11 = vsyncpa [#allocation7], 0 }
   0x2   :  { %12 = vsyncpa [#allocation5], 0  ;;  %s3024_s18 = smov [#allocation6]   ;;  %s2930_s22 = scalar_lea.hbm %s3519_s1, 6144 }
   0x3   :  { %s30_s19 = sshll.u32 %s3024_s18, 4  ;;  %p2931_p0 = scmp.ne.s32.totalorder %s3519_s1, %s2930_s22  ;;  %s31_s19 = int_to_ptr.vmem [resolvable:$true] %s30_s19 }
   0x4   :  { %p2934_p1 = scmp.lt.u32.totalorder %s2930_s22, %s3519_s1 }
   0x6   :  { %p2936_p2 = pnand %p2934_p1, %p2931_p0 }
   0x8   :  { %2939 = shalt.err (!%p2936_p2)
}
   0x9   :  { %s2940_s27 = scalar_lea.vmem %s31_s19, 6144  ;;  %p2945_p4 = scmp.lt.s32.totalorder %s31_s19, %s31_s19 }
   0xa   :  { %p2941_p3 = scmp.ne.s32.totalorder %s31_s19, %s2940_s27  ;;  %p2946_p5 = scmp.lt.s32.totalorder %s2940_s27, %s2940_s27 }
   0xc   :  { %p2947_p6 = por %p2946_p5, %p2945_p4 }
   0xe   :  { %p2948_p7 = pnand %p2947_p6, %p2941_p3 }
  0x10   :  { %2951 = shalt.err (!%p2948_p7)
}
  0x11   :  { %s3025_s28 = smov 384   ;;  %s3026_s29 = smov 24  }
  0x12   :  { %36 = dma.hbm_to_vmem [thread:$0]  %s3519_s1, 6144, %s31_s19, [#allocation7], %s3025_s28, %s3025_s28, %s3026_s29  }
  0x13   :  { %s3027_s7 = smov [#allocation3]   ;;  %s2952_s11 = scalar_lea.hbm %s3518_s0, 1024 }
  0x14   :  { %s18_s8 = sshll.u32 %s3027_s7, 4  ;;  %p2953_p8 = scmp.ne.s32.totalorder %s3518_s0, %s2952_s11  ;;  %s19_s8 = int_to_ptr.vmem [resolvable:$true] %s18_s8 }
  0x15   :  { %p2956_p9 = scmp.lt.u32.totalorder %s2952_s11, %s3518_s0 }
  0x17   :  { %p2958_p10 = pnand %p2956_p9, %p2953_p8 }
  0x19   :  { %2961 = shalt.err (!%p2958_p10)
}
  0x1a   :  { %s2962_s16 = scalar_lea.vmem %s19_s8, 1024  ;;  %p2967_p12 = scmp.lt.s32.totalorder %s19_s8, %s19_s8 }
  0x1b   :  { %p2963_p11 = scmp.ne.s32.totalorder %s19_s8, %s2962_s16  ;;  %p2968_p13 = scmp.lt.s32.totalorder %s2962_s16, %s2962_s16 }
  0x1d   :  { %p2969_p0 = por %p2968_p13, %p2967_p12 }
  0x1f   :  { %p2970_p1 = pnand %p2969_p0, %p2963_p11 }
  0x21   :  { %2973 = shalt.err (!%p2970_p1)
}
  0x22   :  { %s3028_s1 = smov 128   ;;  %s3029_s17 = smov 8  }
  0x23   :  { %24 = dma.hbm_to_vmem [thread:$0]  %s3518_s0, 1024, %s19_s8, [#allocation4], %s3028_s1, %s3028_s1, %s3029_s17  }
  0x24   :  { %s3030_s20 = smov [#allocation8]   ;;  %s2974_s24 = scalar_lea.hbm %s3520_s2, 6144 }
  0x25   :  { %s42_s21 = sshll.u32 %s3030_s20, 4  ;;  %p2975_p2 = scmp.ne.s32.totalorder %s3520_s2, %s2974_s24  ;;  %s43_s21 = int_to_ptr.vmem [resolvable:$true] %s42_s21 }
  0x26   :  { %p2978_p3 = scmp.lt.u32.totalorder %s2974_s24, %s3520_s2 }
  0x28   :  { %p2980_p4 = pnand %p2978_p3, %p2975_p2 }
  0x2a   :  { %2983 = shalt.err (!%p2980_p4)
}
  0x2b   :  { %s2984_s6 = scalar_lea.vmem %s43_s21, 6144  ;;  %p2989_p6 = scmp.lt.s32.totalorder %s43_s21, %s43_s21 }
  0x2c   :  { %p2985_p5 = scmp.ne.s32.totalorder %s43_s21, %s2984_s6  ;;  %p2990_p7 = scmp.lt.s32.totalorder %s2984_s6, %s2984_s6 }
  0x2e   :  { %p2991_p8 = por %p2990_p7, %p2989_p6 }
  0x30   :  { %p2992_p9 = pnand %p2991_p8, %p2985_p5 }
  0x32   :  { %2995 = shalt.err (!%p2992_p9)
}
  0x33   :  { %48 = dma.hbm_to_vmem [thread:$0]  %s3520_s2, 6144, %s43_s21, [#allocation7], %s3025_s28, %s3025_s28, %s3026_s29  }
  0x34   :  { %3018 = dma.done.wait [#allocation4], 1024  }
  0x35   :  { %3019 = vsyncadd [#allocation4], 4294966272 }
  0x36   :  { %3020 = dma.done.wait [#allocation7], 12288  }
  0x37   :  { %3021 = vsyncadd [#allocation7], 4294955008  ;;  %v3031_v0 = vmov 0.0   ;;  %v71_v1 = vld [vmem:[#allocation6 + $0x8] sm:$0xff]  ;;  %v74_v2 = vld [vmem:[#allocation6 + $0x20] sm:$0xff]  ;;  %vm3033_vm0 = vmmov 0  }
  0x38   :  { %199 = vmatprep.mubr.f32.mxu0 %v3031_v0  ;;  %v70_v3 = vld [vmem:[#allocation6] sm:$0xff]  ;;  %v2279_v4 = vpack.c.bf16 %v74_v2, %v71_v1  ;;  %v73_v5 = vld [vmem:[#allocation6 + $0x18] sm:$0xff]  ;;  %v80_v7 = vld [vmem:[#allocation6 + $0x50] sm:$0xff] }
  0x39   :  { %v77_v6 = vld [vmem:[#allocation6 + $0x38] sm:$0xff]  ;;  %v2281_v8 = vpack.c.bf16 %v73_v5, %v70_v3  ;;  %v76_v10 = vld [vmem:[#allocation6 + $0x30] sm:$0xff]  ;;  %v79_v11 = vld [vmem:[#allocation6 + $0x48] sm:$0xff] }
  0x3a   :  { %v2283_v9 = vpack.c.bf16 %v80_v7, %v77_v6  ;;  %v83_v12 = vld [vmem:[#allocation6 + $0x68] sm:$0xff]  ;;  %2280 = vmatprep.subr.bf16.mxu0 %v2279_v4  ;;  %v86_v13 = vld [vmem:[#allocation6 + $0x80] sm:$0xff]  ;;  %v2285_v14 = vpack.c.bf16 %v79_v11, %v76_v10  ;;  %v85_v17 = vld [vmem:[#allocation6 + $0x78] sm:$0xff] }
  0x3b   :  { %2282 = vmatpush1.bf16.msra.mxu0 %v2281_v8  ;;  %v2287_v15 = vpack.c.bf16 %v86_v13, %v83_v12  ;;  %v82_v16 = vld [vmem:[#allocation6 + $0x60] sm:$0xff]  ;;  %v89_v18 = vld [vmem:[#allocation6 + $0x98] sm:$0xff]  ;;  %v92_v19 = vld [vmem:[#allocation6 + $0xb0] sm:$0xff] }
  0x3c   :  { %2284 = vmatprep.subr.bf16.mxu0 %v2283_v9  ;;  %v2289_v20 = vpack.c.bf16 %v85_v17, %v82_v16  ;;  %v88_v21 = vld [vmem:[#allocation6 + $0x90] sm:$0xff]  ;;  %v2291_v22 = vpack.c.bf16 %v92_v19, %v89_v18  ;;  %v91_v23 = vld [vmem:[#allocation6 + $0xa8] sm:$0xff]  ;;  %v98_v27 = vld [vmem:[#allocation6 + $0xe0] sm:$0xff] }
  0x3d   :  { %v72_v24 = vld [vmem:[#allocation6 + $0x10] sm:$0xff]  ;;  %v75_v25 = vld [vmem:[#allocation6 + $0x28] sm:$0xff]  ;;  %v78_v29 = vld [vmem:[#allocation6 + $0x40] sm:$0xff]  ;;  %v2293_v31 = vpack.c.bf16 %v91_v23, %v88_v21 }
  0x3e   :  { %v95_v26 = vld [vmem:[#allocation6 + $0xc8] sm:$0xff]  ;;  %v2311_v28 = vpack.c.bf16 %v75_v25, %v72_v24  ;;  %v81_v30 = vld [vmem:[#allocation6 + $0x58] sm:$0xff]  ;;  %v94_v32 = vld [vmem:[#allocation6 + $0xc0] sm:$0xff] }
  0x3f   :  { %2286 = vmatpush1.bf16.msra.mxu0 %v2285_v14  ;;  %v2315_v33 = vpack.c.bf16 %v81_v30, %v78_v29  ;;  %v2295_v34 = vpack.c.bf16 %v98_v27, %v95_v26  ;;  %v97_v35 = vld [vmem:[#allocation6 + $0xd8] sm:$0xff]  ;;  %v3108_v36 = vld [vmem:[#allocation3] sm:$0xff]  ;;  %v84_v37 = vld [vmem:[#allocation6 + $0x70] sm:$0xff] }
  0x40   :  { %2288 = vmatprep.subr.bf16.mxu0 %v2287_v15  ;;  %2312 = vmatprep.subr.bf16.mxu1 %v2311_v28  ;;  %v101_v38 = vld [vmem:[#allocation6 + $0xf8] sm:$0xff]  ;;  %v104_v39 = vld [vmem:[#allocation6 + $0x110] sm:$0xff]  ;;  %v87_v40 = vld [vmem:[#allocation6 + $0x88] sm:$0xff]  ;;  %v2297_v42 = vpack.c.bf16 %v97_v35, %v94_v32 }
  0x41   :  { %2314 = vmatpush3.bf16.msra.mxu1 %v2311_v28  ;;  %1987 = vmatprep.mubr.f32.mxu1 %v3108_v36  ;;  %v2319_v41 = vpack.c.bf16 %v87_v40, %v84_v37  ;;  %v90_v43 = vld [vmem:[#allocation6 + $0xa0] sm:$0xff]  ;;  %v93_v44 = vld [vmem:[#allocation6 + $0xb8] sm:$0xff]  ;;  %v2299_v45 = vpack.c.bf16 %v104_v39, %v101_v38  ;;  %v100_v46 = vld [vmem:[#allocation6 + $0xf0] sm:$0xff]  ;;  %v3032_v40 = vmov 0.0|0.0  }
  0x42   :  { %2316 = vmatprep.subr.bf16.mxu1 %v2315_v33  ;;  %v103_v47 = vld [vmem:[#allocation6 + $0x108] sm:$0xff]  ;;  %v110_v49 = vld [vmem:[#allocation6 + $0x140] sm:$0xff]  ;;  %v2323_v50 = vpack.c.bf16 %v93_v44, %v90_v43  ;;  %v96_v51 = vld [vmem:[#allocation6 + $0xd0] sm:$0xff] }
  0x43   :  { %2290 = vmatpush1.bf16.msra.mxu0 %v2289_v20  ;;  %v107_v48 = vld [vmem:[#allocation6 + $0x128] sm:$0xff]  ;;  %v2301_v53 = vpack.c.bf16 %v103_v47, %v100_v46  ;;  %v106_v55 = vld [vmem:[#allocation6 + $0x120] sm:$0xff]  ;;  %v109_v56 = vld [vmem:[#allocation6 + $0x138] sm:$0xff] }
  0x44   :  { %2292 = vmatprep.subr.bf16.mxu0 %v2291_v22  ;;  %v99_v52 = vld [vmem:[#allocation6 + $0xe8] sm:$0xff]  ;;  %v2303_v54 = vpack.c.bf16 %v110_v49, %v107_v48  ;;  %v113_v57 = vld [vmem:[#allocation6 + $0x158] sm:$0xff]  ;;  %v116_v58 = vld [vmem:[#allocation6 + $0x170] sm:$0xff]  ;;  %v2305_v62 = vpack.c.bf16 %v109_v56, %v106_v55 }
  0x45   :  { %2318 = vmatpush3.bf16.msra.mxu1 %v2315_v33  ;;  %v2327_v59 = vpack.c.bf16 %v99_v52, %v96_v51  ;;  %v102_v60 = vld [vmem:[#allocation6 + $0x100] sm:$0xff]  ;;  %v105_v61 = vld [vmem:[#allocation6 + $0x118] sm:$0xff]  ;;  %v2307_v63 = vpack.c.bf16 %v116_v58, %v113_v57  ;;  %v112_v1 = vld [vmem:[#allocation6 + $0x150] sm:$0xff] }
  0x46   :  { %2320 = vmatprep.subr.bf16.mxu1 %v2319_v41  ;;  %v115_v2 = vld [vmem:[#allocation6 + $0x168] sm:$0xff]  ;;  %v401_v4 = vld [vmem:[#allocation8 + $0x20] sm:$0xff]  ;;  %v2331_v5 = vpack.c.bf16 %v105_v61, %v102_v60  ;;  %v108_v6 = vld [vmem:[#allocation6 + $0x130] sm:$0xff] }
  0x47   :  { %2294 = vmatpush1.bf16.msra.mxu0 %v2293_v31  ;;  %v398_v3 = vld [vmem:[#allocation8 + $0x8] sm:$0xff]  ;;  %v2309_v8 = vpack.c.bf16 %v115_v2, %v112_v1  ;;  %v397_v10 = vld [vmem:[#allocation8] sm:$0xff]  ;;  %v400_v11 = vld [vmem:[#allocation8 + $0x18] sm:$0xff] }
  0x48   :  { %2296 = vmatprep.subr.bf16.mxu0 %v2295_v34  ;;  %v111_v7 = vld [vmem:[#allocation6 + $0x148] sm:$0xff]  ;;  %v3111_v9 = vpack.c.bf16 %v401_v4, %v398_v3  ;;  %v404_v12 = vld [vmem:[#allocation8 + $0x38] sm:$0xff]  ;;  %v407_v13 = vld [vmem:[#allocation8 + $0x50] sm:$0xff]  ;;  %v3113_v17 = vpack.c.bf16 %v400_v11, %v397_v10 }
  0x49   :  { %2322 = vmatpush3.bf16.msra.mxu1 %v2319_v41  ;;  %v2335_v14 = vpack.c.bf16 %v111_v7, %v108_v6  ;;  %v114_v15 = vld [vmem:[#allocation6 + $0x160] sm:$0xff]  ;;  %v117_v16 = vld [vmem:[#allocation6 + $0x178] sm:$0xff]  ;;  %v3116_v18 = vpack.c.bf16 %v407_v13, %v404_v12  ;;  %v403_v19 = vld [vmem:[#allocation8 + $0x30] sm:$0xff] }
  0x4a   :  { %2324 = vmatprep.subr.bf16.mxu1 %v2323_v50  ;;  %v406_v20 = vld [vmem:[#allocation8 + $0x48] sm:$0xff]  ;;  %v413_v22 = vld [vmem:[#allocation8 + $0x80] sm:$0xff]  ;;  %v2339_v23 = vpack.c.bf16 %v117_v16, %v114_v15  ;;  %v412_v28 = vld [vmem:[#allocation8 + $0x78] sm:$0xff] }
  0x4b   :  { %2298 = vmatpush1.bf16.msra.mxu0 %v2297_v42  ;;  %v410_v21 = vld [vmem:[#allocation8 + $0x68] sm:$0xff]  ;;  %v3121_v25 = vpack.c.bf16 %v406_v20, %v403_v19  ;;  %v409_v27 = vld [vmem:[#allocation8 + $0x60] sm:$0xff]  ;;  %v416_v29 = vld [vmem:[#allocation8 + $0x98] sm:$0xff] }
  0x4c   :  { %2300 = vmatprep.subr.bf16.mxu0 %v2299_v45  ;;  %v63_v24 = vld [vmem:[#allocation3 + $0x8] sm:$0xff]  ;;  %v3124_v26 = vpack.c.bf16 %v413_v22, %v410_v21  ;;  %v419_v30 = vld [vmem:[#allocation8 + $0xb0] sm:$0xff]  ;;  %v3128_v34 = vpack.c.bf16 %v412_v28, %v409_v27  ;;  %v425_v39 = vld [vmem:[#allocation8 + $0xe0] sm:$0xff] }
  0x4d   :  { %2326 = vmatpush3.bf16.msra.mxu1 %v2323_v50  ;;  %v399_v31 = vld [vmem:[#allocation8 + $0x10] sm:$0xff]  ;;  %v402_v32 = vld [vmem:[#allocation8 + $0x28] sm:$0xff]  ;;  %v3131_v35 = vpack.c.bf16 %v419_v30, %v416_v29  ;;  %v405_v42 = vld [vmem:[#allocation8 + $0x40] sm:$0xff] }
  0x4e   :  { %2328 = vmatprep.subr.bf16.mxu1 %v2327_v59  ;;  %v64_v33 = vld [vmem:[#allocation3 + $0x10] sm:$0xff]  ;;  %v418_v37 = vld [vmem:[#allocation8 + $0xa8] sm:$0xff]  ;;  %v3134_v41 = vpack.c.bf16 %v402_v32, %v399_v31  ;;  %v408_v43 = vld [vmem:[#allocation8 + $0x58] sm:$0xff] }
  0x4f   :  { %2302 = vmatpush1.bf16.msra.mxu0 %v2301_v53  ;;  %v422_v38 = vld [vmem:[#allocation8 + $0xc8] sm:$0xff]  ;;  %v65_v44 = vld [vmem:[#allocation3 + $0x18] sm:$0xff]  ;;  %v421_v47 = vld [vmem:[#allocation8 + $0xc0] sm:$0xff]  ;;  %v3144_v51 = vpack.c.bf16 %v408_v43, %v405_v42 }
  0x50   :  { %2304 = vmatprep.subr.bf16.mxu0 %v2303_v54  ;;  %v3141_v46 = vpack.c.bf16 %v425_v39, %v422_v38  ;;  %v424_v48 = vld [vmem:[#allocation8 + $0xd8] sm:$0xff]  ;;  %v431_v50 = vld [vmem:[#allocation8 + $0x110] sm:$0xff]  ;;  %v414_v53 = vld [vmem:[#allocation8 + $0x88] sm:$0xff] }
  0x51   :  { %2330 = vmatpush3.bf16.msra.mxu1 %v2327_v59  ;;  %v428_v49 = vld [vmem:[#allocation8 + $0xf8] sm:$0xff]  ;;  %v411_v52 = vld [vmem:[#allocation8 + $0x70] sm:$0xff]  ;;  %v66_v54 = vld [vmem:[#allocation3 + $0x20] sm:$0xff]  ;;  %v3149_v55 = vpack.c.bf16 %v424_v48, %v421_v47 }
  0x52   :  { %2332 = vmatprep.subr.bf16.mxu1 %v2331_v5  ;;  %v3152_v56 = vpack.c.bf16 %v431_v50, %v428_v49  ;;  %v427_v57 = vld [vmem:[#allocation8 + $0xf0] sm:$0xff]  ;;  %v430_v58 = vld [vmem:[#allocation8 + $0x108] sm:$0xff]  ;;  %v437_v60 = vld [vmem:[#allocation8 + $0x140] sm:$0xff]  ;;  %v3155_v61 = vpack.c.bf16 %v414_v53, %v411_v52 }
  0x53   :  { %2306 = vmatpush1.bf16.msra.mxu0 %v2305_v62  ;;  %v434_v59 = vld [vmem:[#allocation8 + $0x128] sm:$0xff]  ;;  %v417_v62 = vld [vmem:[#allocation8 + $0xa0] sm:$0xff]  ;;  %v3160_v2 = vpack.c.bf16 %v430_v58, %v427_v57  ;;  %v68_v3 = vld [vmem:[#allocation3 + $0x30] sm:$0xff] }
  0x54   :  { %2308 = vmatprep.subr.bf16.mxu0 %v2307_v63  ;;  %v420_v63 = vld [vmem:[#allocation8 + $0xb8] sm:$0xff]  ;;  %v67_v1 = vld [vmem:[#allocation3 + $0x28] sm:$0xff]  ;;  %v3163_v4 = vpack.c.bf16 %v437_v60, %v434_v59  ;;  %v423_v11 = vld [vmem:[#allocation8 + $0xd0] sm:$0xff] }
  0x55   :  { %2334 = vmatpush3.bf16.msra.mxu1 %v2331_v5  ;;  %v433_v5 = vld [vmem:[#allocation8 + $0x120] sm:$0xff]  ;;  %v436_v6 = vld [vmem:[#allocation8 + $0x138] sm:$0xff]  ;;  %v3166_v10 = vpack.c.bf16 %v420_v63, %v417_v62  ;;  %v426_v12 = vld [vmem:[#allocation8 + $0xe8] sm:$0xff] }
  0x56   :  { %2336 = vmatprep.subr.bf16.mxu1 %v2335_v14  ;;  %v440_v7 = vld [vmem:[#allocation8 + $0x158] sm:$0xff]  ;;  %v3171_v13 = vpack.c.bf16 %v436_v6, %v433_v5  ;;  %v439_v16 = vld [vmem:[#allocation8 + $0x150] sm:$0xff]  ;;  %v442_v19 = vld [vmem:[#allocation8 + $0x168] sm:$0xff]  ;;  %v3177_v20 = vpack.c.bf16 %v426_v12, %v423_v11 }
  0x57   :  { %2310 = vmatpush1.bf16.msra.mxu0 %v2309_v8  ;;  %v443_v8 = vld [vmem:[#allocation8 + $0x170] sm:$0xff]  ;;  %v429_v21 = vld [vmem:[#allocation8 + $0x100] sm:$0xff]  ;;  %v432_v22 = vld [vmem:[#allocation8 + $0x118] sm:$0xff] }
  0x58   :  { %2344 = vmatprep.subr.bf16.mxu0 %v3111_v9  ;;  %v3174_v15 = vpack.c.bf16 %v443_v8, %v440_v7  ;;  %v435_v27 = vld [vmem:[#allocation8 + $0x130] sm:$0xff]  ;;  %v438_v28 = vld [vmem:[#allocation8 + $0x148] sm:$0xff]  ;;  %v441_v30 = vld [vmem:[#allocation8 + $0x160] sm:$0xff] }
  0x59   :  { %2338 = vmatpush3.bf16.msra.mxu1 %v2335_v14  ;;  %v69_v14 = vld [vmem:[#allocation3 + $0x38] sm:$0xff]  ;;  %v3195_v29 = vpack.c.bf16 %v438_v28, %v435_v27  ;;  %v118_v38 = vld [vmem:[%s3521_s3] sm:$0x7] }
  0x5a   :  { %200 = vmatmul.mubr.f32.vlgmr.msra.gmra.mrb[0].mxu0 %v3108_v36  ;;  %2340 = vmatprep.subr.bf16.mxu1 %v2339_v23  ;;  %v415_v36 = vld [vmem:[#allocation8 + $0x90] sm:$0xff]  ;;  %v444_v31 = vld [vmem:[#allocation8 + $0x178] sm:$0xff]  ;;  %v377_v59 = vld [vmem:[%s3522_s4] sm:$0x7]  ;;  %s3034_s4 = smov [#allocation9]  }
  0x5b   :  { %2346 = vmatpush1.bf16.msra.mxu0 %v3113_v17  ;;  %205 = vmatprep.mubr.f32.mxu0 %v3031_v0  ;;  %v3138_v45 = vpack.c.bf16 %v418_v37, %v415_v36  ;;  %v3203_v32 = vpack.c.bf16 %v444_v31, %v441_v30  ;;  %s1769_s8 = sshll.u32 %s3034_s4, 4  ;;  %s1770_s8 = int_to_ptr.vmem [resolvable:$true] %s1769_s8 }
  0x5c   :  { %2348 = vmatprep.subr.bf16.mxu0 %v3116_v18  ;;  %s2996_s9 = scalar_lea.vmem %s1770_s8, 128  ;;  %p3001_p11 = scmp.lt.s32.totalorder %s1770_s8, %s1770_s8 }
  0x5d   :  { %2342 = vmatpush3.bf16.msra.mxu1 %v2339_v23  ;;  %v3184_v23 = vpack.c.bf16 %v442_v19, %v439_v16  ;;  %p2997_p10 = scmp.ne.s32.totalorder %s1770_s8, %s2996_s9  ;;  %p3002_p12 = scmp.lt.s32.totalorder %s2996_s9, %s2996_s9 }
  0x5e   :  { %206 = vmatmul.mubr.f32.gmra.mrb[2].mxu0 %v63_v24  ;;  %2375 = vmatprep.subr.bf16.mxu1 %v3032_v40 }
  0x5f   :  { %2350 = vmatpush1.bf16.msra.mxu0 %v3121_v25  ;;  %211 = vmatprep.mubr.f32.mxu0 %v3031_v0  ;;  %p3003_p13 = por %p3002_p12, %p3001_p11 }
  0x60   :  { %2352 = vmatprep.subr.bf16.mxu0 %v3124_v26  ;;  %1988 = vmatmul.mubr.f32.vlgmr.msra.gmra.mrb[0].mxu1 %v63_v24  ;;  %v3188_v24 = vpack.c.bf16 %v432_v22, %v429_v21 }
  0x61   :  { %2377 = vmatpush3.bf16.msra.mxu1 %v3134_v41  ;;  %1990 = vmatprep.mubr.f32.mxu1 %v64_v33  ;;  %p3004_p0 = pnand %p3003_p13, %p2997_p10 }
  0x62   :  { %212 = vmatmul.mubr.f32.gmra.mrb[4].mxu0 %v64_v33  ;;  %2378 = vmatprep.subr.bf16.mxu1 %v3032_v40  ;;  %v120_v33 = vlaneseq }
  0x63   :  { %2354 = vmatpush1.bf16.msra.mxu0 %v3128_v34  ;;  %217 = vmatprep.mubr.f32.mxu0 %v3031_v0 }
  0x64   :  { %2356 = vmatprep.subr.bf16.mxu0 %v3131_v35  ;;  %1991 = vmatmul.mubr.f32.gmra.mrb[2].mxu1 %v65_v44  ;;  %v121_v36 = vshrl.u32 %v120_v33, 7 }
  0x65   :  { %2380 = vmatpush3.bf16.msra.mxu1 %v3144_v51  ;;  %1993 = vmatprep.mubr.f32.mxu1 %v66_v54 }
  0x66   :  { %218 = vmatmul.mubr.f32.gmra.mrb[6].mxu0 %v65_v44  ;;  %2381 = vmatprep.subr.bf16.mxu1 %v3032_v40  ;;  %v130_v37 = vsub.s32 2, %v121_v36  ;;  %v122_v58 = vsub.s32 0, %v121_v36 }
  0x67   :  { %2358 = vmatpush1.bf16.msra.mxu0 %v3138_v45  ;;  %223 = vmatprep.mubr.f32.mxu0 %v3031_v0 }
  0x68   :  { %2360 = vmatprep.subr.bf16.mxu0 %v3141_v46  ;;  %1994 = vmatmul.mubr.f32.gmra.mrb[4].mxu1 %v67_v1  ;;  %v131_v39 = vrot.slane %v118_v38, %v130_v37  ;;  %v123_v5 = vrot.slane %v118_v38, %v122_v58  ;;  %v382_v6 = vrot.slane %v377_v59, %v122_v58 }
  0x69   :  { %2383 = vmatpush3.bf16.msra.mxu1 %v3155_v61  ;;  %1996 = vmatprep.mubr.f32.mxu1 %v68_v3 }
  0x6a   :  { %224 = vmatmul.mubr.f32.gmra.mrb[8].mxu0 %v66_v54  ;;  %2384 = vmatprep.subr.bf16.mxu1 %v3032_v40  ;;  %v3261_v11 = vadd.f32 %v382_v6, %v123_v5 }
  0x6b   :  { %2362 = vmatpush1.bf16.msra.mxu0 %v3149_v55  ;;  %229 = vmatprep.mubr.f32.mxu0 %v3031_v0 }
  0x6c   :  { %2364 = vmatprep.subr.bf16.mxu0 %v3152_v56  ;;  %1997 = vmatmul.mubr.f32.gmra.mrb[6].mxu1 %v69_v14 }
  0x6d   :  { %2386 = vmatpush3.bf16.msra.mxu1 %v3166_v10  ;;  %2031 = vmatprep.mubr.msk.f32.mxu1 %vm3033_vm0, %v3031_v0 }
  0x6e   :  { %230 = vmatmul.mubr.f32.gmra.mrb[10].mxu0 %v67_v1  ;;  %2387 = vmatprep.subr.bf16.mxu1 %v3032_v40  ;;  %v126_v1 = vsub.s32 1, %v121_v36  ;;  %v3267_v36 = vrot.slane %v377_v59, %v130_v37 }
  0x6f   :  { %2366 = vmatpush1.bf16.msra.mxu0 %v3160_v2  ;;  %235 = vmatprep.mubr.f32.mxu0 %v3031_v0 }
  0x70   :  { %2368 = vmatprep.subr.bf16.mxu0 %v3163_v4  ;;  %v127_v7 = vrot.slane %v118_v38, %v126_v1  ;;  %v386_v8 = vrot.slane %v377_v59, %v126_v1 }
  0x71   :  { %2389 = vmatpush3.bf16.msra.mxu1 %v3177_v20 }
  0x72   :  { %236 = vmatmul.mubr.f32.gmra.mrb[12].mxu0 %v68_v3  ;;  %2390 = vmatprep.subr.bf16.mxu1 %v3032_v40 }
  0x73   :  { %2370 = vmatpush1.bf16.msra.mxu0 %v3171_v13  ;;  %241 = vmatprep.mubr.f32.mxu0 %v3031_v0 }
  0x74   :  { %2372 = vmatprep.subr.bf16.mxu0 %v3174_v15 }
  0x75   :  { %2392 = vmatpush3.bf16.msra.mxu1 %v3188_v24 }
  0x76   :  { %242 = vmatmul.mubr.f32.gmra.mrb[14].mxu0 %v69_v14  ;;  %2393 = vmatprep.subr.bf16.mxu1 %v3032_v40  ;;  %v3263_v14 = vadd.f32 %v386_v8, %v127_v7 }
  0x77   :  { %2374 = vmatpush1.bf16.msra.mxu0 %v3184_v23  ;;  %509 = vmatprep.mubr.f32.mxu0 %v3031_v0 }
  0x78   :  { %2400 = vmatprep.subr.bf16.mxu0 %v3111_v9 }
  0x79   :  { %2395 = vmatpush3.bf16.msra.mxu1 %v3195_v29 }
  0x7a   :  { %510 = vmatmul.mubr.f32.vlgmr.msra.gmra.mrb[0].mxu0 %v3031_v0  ;;  %2396 = vmatprep.subr.bf16.mxu1 %v3032_v40 }
  0x7b   :  { %2402 = vmatpush1.bf16.msra.mxu0 %v3113_v17  ;;  %674 = vmatprep.mubr.f32.mxu0 %v3031_v0 }
  0x7c   :  { %2404 = vmatprep.subr.bf16.mxu0 %v3116_v18 }
  0x7d   :  { %2398 = vmatpush3.bf16.msra.mxu1 %v3203_v32 }
  0x7e   :  { %2431 = vmatprep.subr.bf16.mxu1 %v3032_v40 }
  0x7f   :  { %2406 = vmatpush1.bf16.msra.mxu0 %v3121_v25 }
  0x80   :  { %2408 = vmatprep.subr.bf16.mxu0 %v3124_v26  ;;  %2032 = vmatmul.mubr.f32.vlgmr.msra.gmra.mrb[8].mxu1 %v3031_v0 }
  0x81   :  { %2433 = vmatpush3.bf16.msra.mxu1 %v3134_v41  ;;  %2066 = vmatprep.mubr.msk.f32.mxu1 %vm3033_vm0, %v3031_v0 }
  0x82   :  { %2434 = vmatprep.subr.bf16.mxu1 %v3032_v40 }
  0x83   :  { %2410 = vmatpush1.bf16.msra.mxu0 %v3128_v34 }
  0x84   :  { %2412 = vmatprep.subr.bf16.mxu0 %v3131_v35 }
  0x85   :  { %2436 = vmatpush3.bf16.msra.mxu1 %v3144_v51 }
  0x86   :  { %2437 = vmatprep.subr.bf16.mxu1 %v3032_v40 }
  0x87   :  { %2414 = vmatpush1.bf16.msra.mxu0 %v3138_v45 }
  0x88   :  { %2416 = vmatprep.subr.bf16.mxu0 %v3141_v46 }
  0x89   :  { %2439 = vmatpush3.bf16.msra.mxu1 %v3155_v61 }
  0x8a   :  { %2440 = vmatprep.subr.bf16.mxu1 %v3032_v40 }
  0x8b   :  { %2418 = vmatpush1.bf16.msra.mxu0 %v3149_v55 }
  0x8c   :  { %2420 = vmatprep.subr.bf16.mxu0 %v3152_v56 }
  0x8d   :  { %2442 = vmatpush3.bf16.msra.mxu1 %v3166_v10 }
  0x8e   :  { %2443 = vmatprep.subr.bf16.mxu1 %v3032_v40 }
  0x8f   :  { %2422 = vmatpush1.bf16.msra.mxu0 %v3160_v2 }
  0x90   :  { %2424 = vmatprep.subr.bf16.mxu0 %v3163_v4 }
  0x91   :  { %2445 = vmatpush3.bf16.msra.mxu1 %v3177_v20 }
  0x92   :  { %2446 = vmatprep.subr.bf16.mxu1 %v3032_v40 }
  0x93   :  { %2426 = vmatpush1.bf16.msra.mxu0 %v3171_v13 }
  0x94   :  { %2428 = vmatprep.subr.bf16.mxu0 %v3174_v15 }
  0x95   :  { %2448 = vmatpush3.bf16.msra.mxu1 %v3188_v24 }
  0x96   :  { %2449 = vmatprep.subr.bf16.mxu1 %v3032_v40 }
  0x97   :  { %2430 = vmatpush1.bf16.msra.mxu0 %v3184_v23 }
  0x98   :  { %2456 = vmatprep.subr.bf16.mxu0 %v3111_v9 }
  0x99   :  { %2451 = vmatpush3.bf16.msra.mxu1 %v3195_v29 }
  0x9a   :  { %2452 = vmatprep.subr.bf16.mxu1 %v3032_v40 }
  0x9d   :  { %2454 = vmatpush3.bf16.msra.mxu1 %v3203_v32 }
  0x9e   :  { %2487 = vmatprep.subr.bf16.mxu1 %v3032_v40 }
 0x133   :  { %v1989_v42 = vpop.f32.mrb[0].mxu1 }
 0x134   :  { %v3244_v43 = vadd.f32 %v1989_v42, %v131_v39  ;;  %v314_v44 = vpop.f32.mrb[1].mxu1 }
 0x137   :  { %v1992_v47 = vpop.f32.mrb[2].mxu1 }
 0x138   :  { %v3246_v48 = vadd.f32 %v1992_v47, %v131_v39  ;;  %v324_v49 = vpop.f32.mrb[3].mxu1 }
 0x139   :  { %v3248_v50 = vadd.f32 %v324_v49, %v131_v39 }
 0x13b   :  { %v1995_v52 = vpop.f32.mrb[4].mxu1 }
 0x13c   :  { %v3250_v53 = vadd.f32 %v1995_v52, %v131_v39  ;;  %v334_v54 = vpop.f32.mrb[5].mxu1  ;;  %v315_v52 = vadd.f32 %v314_v44, %v131_v39 }
 0x13d   :  { %v3252_v57 = vadd.f32 %v334_v54, %v131_v39 }
 0x13f   :  { %v1998_v60 = vpop.f32.mrb[6].mxu1 }
 0x140   :  { %v3257_v62 = vadd.f32 %v1998_v60, %v131_v39  ;;  %v344_v63 = vpop.f32.mrb[7].mxu1 }
 0x141   :  { %v3259_v3 = vadd.f32 %v344_v63, %v131_v39 }
 0x14d   :  { %v511_v12 = vpop.f32.mrb[0].mxu0 }
 0x14e   :  { %v2792_v16 = vadd.f32 %v3261_v11, %v511_v12  ;;  %v513_v19 = vpop.f32.mrb[1].mxu0 }
 0x14f   :  { %v2794_v22 = vadd.f32 %v3263_v14, %v513_v19 }
 0x150   :  { %v1779_v21 = vmul.f32 -1.442695, %v2792_v16 }
 0x151   :  { %v1780_v27 = vmul.f32 -1.442695, %v2794_v22 }
 0x152   :  { %2850 = vpow2.f32 %v1779_v21 }
 0x153   :  { %v582_v28 = vpop.f32.mrb[8].mxu1  ;;  %2852 = vpow2.f32 %v1780_v27 }
 0x154   :  { %v2033_v30 = vpop.f32.mrb[9].mxu1  ;;  %v583_v47 = vadd.f32 %v582_v28, %v3267_v36 }
 0x15c   :  { %v2851_v31 = vpop.eup %2850 }
 0x15d   :  { %v590_v33 = vadd.f32 1.0, %v2851_v31  ;;  %v2853_v38 = vpop.eup %2852 }
 0x15e   :  { %v597_v42 = vadd.f32 1.0, %v2853_v38 }
 0x15f   :  { %2854 = vrcp.f32 %v590_v33 }
 0x160   :  { %2856 = vrcp.f32 %v597_v42 }
 0x169   :  { %v2855_v49 = vpop.eup %2854 }
 0x16a   :  { %v600_v54 = vmul.f32 %v2855_v49, %v583_v47  ;;  %v2857_v60 = vpop.eup %2856 }
 0x16b   :  { %v603_v63 = vsub.f32 1.0, %v2857_v60  ;;  %v605_v6 = vmul.f32 0.0, %v2857_v60 }
 0x16c   :  { %v601_v58 = vadd.f32 %v600_v54, %v315_v52 }
 0x16e   :  { %2858 = vtanh.f32 %v601_v58 }
 0x178   :  { %v2859_v1 = vpop.eup %2858 }
 0x179   :  { %v604_v5 = vmul.f32 %v2859_v1, %v603_v63 }
 0x17b   :  { %v606_v7 = vadd.f32 %v605_v6, %v604_v5 }
 0x17d   :  { %675 = vmatmul.mubr.f32.vlgmr.msra.gmra.mrb[2].mxu0 %v606_v7  ;;  %2067 = vmatmul.mubr.f32.vlgmr.msra.gmra.mrb[10].mxu1 %v606_v7 }
 0x17e   :  { %2458 = vmatpush1.bf16.msra.mxu0 %v3113_v17  ;;  %2489 = vmatpush3.bf16.msra.mxu1 %v3134_v41 }
 0x17f   :  { %2460 = vmatprep.subr.bf16.mxu0 %v3116_v18  ;;  %2490 = vmatprep.subr.bf16.mxu1 %v3032_v40 }
 0x180   :  { %839 = vmatprep.mubr.f32.mxu0 %v3031_v0  ;;  %2101 = vmatprep.mubr.msk.f32.mxu1 %vm3033_vm0, %v3031_v0 }
 0x182   :  { %2462 = vmatpush1.bf16.msra.mxu0 %v3121_v25  ;;  %2492 = vmatpush3.bf16.msra.mxu1 %v3144_v51 }
 0x183   :  { %2464 = vmatprep.subr.bf16.mxu0 %v3124_v26  ;;  %2493 = vmatprep.subr.bf16.mxu1 %v3032_v40 }
 0x186   :  { %2466 = vmatpush1.bf16.msra.mxu0 %v3128_v34  ;;  %2495 = vmatpush3.bf16.msra.mxu1 %v3155_v61 }
 0x187   :  { %2468 = vmatprep.subr.bf16.mxu0 %v3131_v35  ;;  %2496 = vmatprep.subr.bf16.mxu1 %v3032_v40 }
 0x18a   :  { %2470 = vmatpush1.bf16.msra.mxu0 %v3138_v45  ;;  %2498 = vmatpush3.bf16.msra.mxu1 %v3166_v10 }
 0x18b   :  { %2472 = vmatprep.subr.bf16.mxu0 %v3141_v46  ;;  %2499 = vmatprep.subr.bf16.mxu1 %v3032_v40 }
 0x18e   :  { %2474 = vmatpush1.bf16.msra.mxu0 %v3149_v55  ;;  %2501 = vmatpush3.bf16.msra.mxu1 %v3177_v20 }
 0x18f   :  { %2476 = vmatprep.subr.bf16.mxu0 %v3152_v56  ;;  %2502 = vmatprep.subr.bf16.mxu1 %v3032_v40 }
 0x192   :  { %2478 = vmatpush1.bf16.msra.mxu0 %v3160_v2  ;;  %2504 = vmatpush3.bf16.msra.mxu1 %v3188_v24 }
 0x193   :  { %2480 = vmatprep.subr.bf16.mxu0 %v3163_v4  ;;  %2505 = vmatprep.subr.bf16.mxu1 %v3032_v40 }
 0x196   :  { %2482 = vmatpush1.bf16.msra.mxu0 %v3171_v13  ;;  %2507 = vmatpush3.bf16.msra.mxu1 %v3195_v29 }
 0x197   :  { %2484 = vmatprep.subr.bf16.mxu0 %v3174_v15  ;;  %2508 = vmatprep.subr.bf16.mxu1 %v3032_v40 }
 0x19a   :  { %2486 = vmatpush1.bf16.msra.mxu0 %v3184_v23  ;;  %2510 = vmatpush3.bf16.msra.mxu1 %v3203_v32 }
 0x19b   :  { %2512 = vmatprep.subr.bf16.mxu0 %v3111_v9  ;;  %2543 = vmatprep.subr.bf16.mxu1 %v3032_v40 }
 0x250   :  { %v676_v37 = vpop.f32.mrb[2].mxu0  ;;  %v747_v39 = vpop.f32.mrb[10].mxu1 }
 0x251   :  { %v2796_v44 = vadd.f32 %v3261_v11, %v676_v37  ;;  %v678_v59 = vpop.f32.mrb[3].mxu0  ;;  %v2068_v8 = vpop.f32.mrb[11].mxu1  ;;  %v748_v30 = vadd.f32 %v747_v39, %v3267_v36 }
 0x252   :  { %v2798_v16 = vadd.f32 %v3263_v14, %v678_v59 }
 0x253   :  { %v1781_v12 = vmul.f32 -1.442695, %v2796_v44 }
 0x254   :  { %v1782_v19 = vmul.f32 -1.442695, %v2798_v16 }
 0x255   :  { %2860 = vpow2.f32 %v1781_v12 }
 0x256   :  { %2862 = vpow2.f32 %v1782_v19 }
 0x25f   :  { %v2861_v21 = vpop.eup %2860 }
 0x260   :  { %v755_v22 = vadd.f32 1.0, %v2861_v21  ;;  %v2863_v27 = vpop.eup %2862 }
 0x261   :  { %v762_v28 = vadd.f32 1.0, %v2863_v27 }
 0x262   :  { %2864 = vrcp.f32 %v755_v22 }
 0x263   :  { %2866 = vrcp.f32 %v762_v28 }
 0x26c   :  { %v2865_v31 = vpop.eup %2864 }
 0x26d   :  { %v765_v33 = vmul.f32 %v2865_v31, %v748_v30  ;;  %v2867_v42 = vpop.eup %2866 }
 0x26e   :  { %v768_v47 = vsub.f32 1.0, %v2867_v42  ;;  %v770_v54 = vmul.f32 %v2867_v42, %v606_v7 }
 0x26f   :  { %v766_v38 = vadd.f32 %v765_v33, %v3244_v43 }
 0x271   :  { %2868 = vtanh.f32 %v766_v38 }
 0x27b   :  { %v2869_v49 = vpop.eup %2868 }
 0x27c   :  { %v769_v52 = vmul.f32 %v2869_v49, %v768_v47 }
 0x27e   :  { %v771_v58 = vadd.f32 %v770_v54, %v769_v52 }
 0x280   :  { %840 = vmatmul.mubr.f32.vlgmr.msra.gmra.mrb[4].mxu0 %v771_v58  ;;  %2102 = vmatmul.mubr.f32.vlgmr.msra.gmra.mrb[12].mxu1 %v771_v58 }
 0x281   :  { %2514 = vmatpush1.bf16.msra.mxu0 %v3113_v17  ;;  %2545 = vmatpush3.bf16.msra.mxu1 %v3134_v41 }
 0x282   :  { %2516 = vmatprep.subr.bf16.mxu0 %v3116_v18  ;;  %2546 = vmatprep.subr.bf16.mxu1 %v3032_v40 }
 0x283   :  { %1004 = vmatprep.mubr.f32.mxu0 %v3031_v0  ;;  %2136 = vmatprep.mubr.msk.f32.mxu1 %vm3033_vm0, %v3031_v0 }
 0x285   :  { %2518 = vmatpush1.bf16.msra.mxu0 %v3121_v25  ;;  %2548 = vmatpush3.bf16.msra.mxu1 %v3144_v51 }
 0x286   :  { %2520 = vmatprep.subr.bf16.mxu0 %v3124_v26  ;;  %2549 = vmatprep.subr.bf16.mxu1 %v3032_v40 }
 0x289   :  { %2522 = vmatpush1.bf16.msra.mxu0 %v3128_v34  ;;  %2551 = vmatpush3.bf16.msra.mxu1 %v3155_v61 }
 0x28a   :  { %2524 = vmatprep.subr.bf16.mxu0 %v3131_v35  ;;  %2552 = vmatprep.subr.bf16.mxu1 %v3032_v40 }
 0x28d   :  { %2526 = vmatpush1.bf16.msra.mxu0 %v3138_v45  ;;  %2554 = vmatpush3.bf16.msra.mxu1 %v3166_v10 }
 0x28e   :  { %2528 = vmatprep.subr.bf16.mxu0 %v3141_v46  ;;  %2555 = vmatprep.subr.bf16.mxu1 %v3032_v40 }
 0x291   :  { %2530 = vmatpush1.bf16.msra.mxu0 %v3149_v55  ;;  %2557 = vmatpush3.bf16.msra.mxu1 %v3177_v20 }
 0x292   :  { %2532 = vmatprep.subr.bf16.mxu0 %v3152_v56  ;;  %2558 = vmatprep.subr.bf16.mxu1 %v3032_v40 }
 0x295   :  { %2534 = vmatpush1.bf16.msra.mxu0 %v3160_v2  ;;  %2560 = vmatpush3.bf16.msra.mxu1 %v3188_v24 }
 0x296   :  { %2536 = vmatprep.subr.bf16.mxu0 %v3163_v4  ;;  %2561 = vmatprep.subr.bf16.mxu1 %v3032_v40 }
 0x299   :  { %2538 = vmatpush1.bf16.msra.mxu0 %v3171_v13  ;;  %2563 = vmatpush3.bf16.msra.mxu1 %v3195_v29 }
 0x29a   :  { %2540 = vmatprep.subr.bf16.mxu0 %v3174_v15  ;;  %2564 = vmatprep.subr.bf16.mxu1 %v3032_v40 }
 0x29d   :  { %2542 = vmatpush1.bf16.msra.mxu0 %v3184_v23  ;;  %2566 = vmatpush3.bf16.msra.mxu1 %v3203_v32 }
 0x29e   :  { %2568 = vmatprep.subr.bf16.mxu0 %v3111_v9  ;;  %2599 = vmatprep.subr.bf16.mxu1 %v3032_v40 }
 0x353   :  { %v841_v43 = vpop.f32.mrb[4].mxu0  ;;  %v912_v60 = vpop.f32.mrb[12].mxu1 }
 0x354   :  { %v2800_v63 = vadd.f32 %v3261_v11, %v841_v43  ;;  %v843_v1 = vpop.f32.mrb[5].mxu0  ;;  %v2103_v5 = vpop.f32.mrb[13].mxu1  ;;  %v913_v12 = vadd.f32 %v912_v60, %v3267_v36 }
 0x355   :  { %v2802_v7 = vadd.f32 %v3263_v14, %v843_v1 }
 0x356   :  { %v1783_v6 = vmul.f32 -1.442695, %v2800_v63 }
 0x357   :  { %v1784_v37 = vmul.f32 -1.442695, %v2802_v7 }
 0x358   :  { %2870 = vpow2.f32 %v1783_v6 }
 0x359   :  { %2872 = vpow2.f32 %v1784_v37 }
 0x362   :  { %v2871_v39 = vpop.eup %2870 }
 0x363   :  { %v920_v44 = vadd.f32 1.0, %v2871_v39  ;;  %v2873_v59 = vpop.eup %2872 }
 0x364   :  { %v927_v8 = vadd.f32 1.0, %v2873_v59 }
 0x365   :  { %2874 = vrcp.f32 %v920_v44 }
 0x366   :  { %2876 = vrcp.f32 %v927_v8 }
 0x36f   :  { %v2875_v16 = vpop.eup %2874 }
 0x370   :  { %v930_v19 = vmul.f32 %v2875_v16, %v913_v12  ;;  %v2877_v22 = vpop.eup %2876 }
 0x371   :  { %v933_v27 = vsub.f32 1.0, %v2877_v22  ;;  %v935_v31 = vmul.f32 %v2877_v22, %v771_v58 }
 0x372   :  { %v931_v21 = vadd.f32 %v930_v19, %v3248_v50 }
 0x374   :  { %2878 = vtanh.f32 %v931_v21 }
 0x37e   :  { %v2879_v28 = vpop.eup %2878 }
 0x37f   :  { %v934_v30 = vmul.f32 %v2879_v28, %v933_v27 }
 0x381   :  { %v936_v33 = vadd.f32 %v935_v31, %v934_v30 }
 0x383   :  { %1005 = vmatmul.mubr.f32.vlgmr.msra.gmra.mrb[6].mxu0 %v936_v33  ;;  %2137 = vmatmul.mubr.f32.vlgmr.msra.gmra.mrb[14].mxu1 %v936_v33 }
 0x384   :  { %2570 = vmatpush1.bf16.msra.mxu0 %v3113_v17  ;;  %2601 = vmatpush3.bf16.msra.mxu1 %v3134_v41 }
 0x385   :  { %2572 = vmatprep.subr.bf16.mxu0 %v3116_v18  ;;  %2602 = vmatprep.subr.bf16.mxu1 %v3032_v40 }
 0x386   :  { %1169 = vmatprep.mubr.f32.mxu0 %v3031_v0  ;;  %2171 = vmatprep.mubr.msk.f32.mxu1 %vm3033_vm0, %v3031_v0 }
 0x388   :  { %2574 = vmatpush1.bf16.msra.mxu0 %v3121_v25  ;;  %2604 = vmatpush3.bf16.msra.mxu1 %v3144_v51 }
 0x389   :  { %2576 = vmatprep.subr.bf16.mxu0 %v3124_v26  ;;  %2605 = vmatprep.subr.bf16.mxu1 %v3032_v40 }
 0x38c   :  { %2578 = vmatpush1.bf16.msra.mxu0 %v3128_v34  ;;  %2607 = vmatpush3.bf16.msra.mxu1 %v3155_v61 }
 0x38d   :  { %2580 = vmatprep.subr.bf16.mxu0 %v3131_v35  ;;  %2608 = vmatprep.subr.bf16.mxu1 %v3032_v40 }
 0x390   :  { %2582 = vmatpush1.bf16.msra.mxu0 %v3138_v45  ;;  %2610 = vmatpush3.bf16.msra.mxu1 %v3166_v10 }
 0x391   :  { %2584 = vmatprep.subr.bf16.mxu0 %v3141_v46  ;;  %2611 = vmatprep.subr.bf16.mxu1 %v3032_v40 }
 0x394   :  { %2586 = vmatpush1.bf16.msra.mxu0 %v3149_v55  ;;  %2613 = vmatpush3.bf16.msra.mxu1 %v3177_v20 }
 0x395   :  { %2588 = vmatprep.subr.bf16.mxu0 %v3152_v56  ;;  %2614 = vmatprep.subr.bf16.mxu1 %v3032_v40 }
 0x398   :  { %2590 = vmatpush1.bf16.msra.mxu0 %v3160_v2  ;;  %2616 = vmatpush3.bf16.msra.mxu1 %v3188_v24 }
 0x399   :  { %2592 = vmatprep.subr.bf16.mxu0 %v3163_v4  ;;  %2617 = vmatprep.subr.bf16.mxu1 %v3032_v40 }
 0x39c   :  { %2594 = vmatpush1.bf16.msra.mxu0 %v3171_v13  ;;  %2619 = vmatpush3.bf16.msra.mxu1 %v3195_v29 }
 0x39d   :  { %2596 = vmatprep.subr.bf16.mxu0 %v3174_v15  ;;  %2620 = vmatprep.subr.bf16.mxu1 %v3032_v40 }
 0x3a0   :  { %2598 = vmatpush1.bf16.msra.mxu0 %v3184_v23  ;;  %2622 = vmatpush3.bf16.msra.mxu1 %v3203_v32 }
 0x3a1   :  { %2624 = vmatprep.subr.bf16.mxu0 %v3111_v9  ;;  %2655 = vmatprep.subr.bf16.mxu1 %v3032_v40 }
 0x456   :  { %v1006_v50 = vpop.f32.mrb[6].mxu0  ;;  %v1077_v38 = vpop.f32.mrb[14].mxu1 }
 0x457   :  { %v2804_v42 = vadd.f32 %v3261_v11, %v1006_v50  ;;  %v1008_v47 = vpop.f32.mrb[7].mxu0  ;;  %v2138_v49 = vpop.f32.mrb[15].mxu1  ;;  %v1078_v5 = vadd.f32 %v1077_v38, %v3267_v36 }
 0x458   :  { %v2806_v54 = vadd.f32 %v3263_v14, %v1008_v47 }
 0x459   :  { %v1785_v52 = vmul.f32 -1.442695, %v2804_v42 }
 0x45a   :  { %v1786_v58 = vmul.f32 -1.442695, %v2806_v54 }
 0x45b   :  { %2880 = vpow2.f32 %v1785_v52 }
 0x45c   :  { %2882 = vpow2.f32 %v1786_v58 }
 0x465   :  { %v2881_v43 = vpop.eup %2880 }
 0x466   :  { %v1085_v60 = vadd.f32 1.0, %v2881_v43  ;;  %v2883_v63 = vpop.eup %2882 }
 0x467   :  { %v1092_v1 = vadd.f32 1.0, %v2883_v63 }
 0x468   :  { %2884 = vrcp.f32 %v1085_v60 }
 0x469   :  { %2886 = vrcp.f32 %v1092_v1 }
 0x472   :  { %v2885_v6 = vpop.eup %2884 }
 0x473   :  { %v1095_v7 = vmul.f32 %v2885_v6, %v1078_v5  ;;  %v2887_v39 = vpop.eup %2886 }
 0x474   :  { %v1098_v44 = vsub.f32 1.0, %v2887_v39  ;;  %v1100_v12 = vmul.f32 %v2887_v39, %v936_v33 }
 0x475   :  { %v1096_v37 = vadd.f32 %v1095_v7, %v3246_v48 }
 0x477   :  { %2888 = vtanh.f32 %v1096_v37 }
 0x481   :  { %v2889_v59 = vpop.eup %2888 }
 0x482   :  { %v1099_v8 = vmul.f32 %v2889_v59, %v1098_v44 }
 0x484   :  { %v1101_v16 = vadd.f32 %v1100_v12, %v1099_v8 }
 0x486   :  { %1170 = vmatmul.mubr.f32.vlgmr.msra.gmra.mrb[8].mxu0 %v1101_v16  ;;  %2172 = vmatmul.mubr.f32.vlgmr.msra.gmra.mrb[16].mxu1 %v1101_v16 }
 0x487   :  { %2626 = vmatpush1.bf16.msra.mxu0 %v3113_v17  ;;  %2657 = vmatpush3.bf16.msra.mxu1 %v3134_v41 }
 0x488   :  { %2628 = vmatprep.subr.bf16.mxu0 %v3116_v18  ;;  %2658 = vmatprep.subr.bf16.mxu1 %v3032_v40 }
 0x489   :  { %1334 = vmatprep.mubr.f32.mxu0 %v3031_v0  ;;  %2206 = vmatprep.mubr.msk.f32.mxu1 %vm3033_vm0, %v3031_v0 }
 0x48b   :  { %2630 = vmatpush1.bf16.msra.mxu0 %v3121_v25  ;;  %2660 = vmatpush3.bf16.msra.mxu1 %v3144_v51 }
 0x48c   :  { %2632 = vmatprep.subr.bf16.mxu0 %v3124_v26  ;;  %2661 = vmatprep.subr.bf16.mxu1 %v3032_v40 }
 0x48f   :  { %2634 = vmatpush1.bf16.msra.mxu0 %v3128_v34  ;;  %2663 = vmatpush3.bf16.msra.mxu1 %v3155_v61 }
 0x490   :  { %2636 = vmatprep.subr.bf16.mxu0 %v3131_v35  ;;  %2664 = vmatprep.subr.bf16.mxu1 %v3032_v40 }
 0x493   :  { %2638 = vmatpush1.bf16.msra.mxu0 %v3138_v45  ;;  %2666 = vmatpush3.bf16.msra.mxu1 %v3166_v10 }
 0x494   :  { %2640 = vmatprep.subr.bf16.mxu0 %v3141_v46  ;;  %2667 = vmatprep.subr.bf16.mxu1 %v3032_v40 }
 0x497   :  { %2642 = vmatpush1.bf16.msra.mxu0 %v3149_v55  ;;  %2669 = vmatpush3.bf16.msra.mxu1 %v3177_v20 }
 0x498   :  { %2644 = vmatprep.subr.bf16.mxu0 %v3152_v56  ;;  %2670 = vmatprep.subr.bf16.mxu1 %v3032_v40 }
 0x49b   :  { %2646 = vmatpush1.bf16.msra.mxu0 %v3160_v2  ;;  %2672 = vmatpush3.bf16.msra.mxu1 %v3188_v24 }
 0x49c   :  { %2648 = vmatprep.subr.bf16.mxu0 %v3163_v4  ;;  %2673 = vmatprep.subr.bf16.mxu1 %v3032_v40 }
 0x49f   :  { %2650 = vmatpush1.bf16.msra.mxu0 %v3171_v13  ;;  %2675 = vmatpush3.bf16.msra.mxu1 %v3195_v29 }
 0x4a0   :  { %2652 = vmatprep.subr.bf16.mxu0 %v3174_v15  ;;  %2676 = vmatprep.subr.bf16.mxu1 %v3032_v40 }
 0x4a3   :  { %2654 = vmatpush1.bf16.msra.mxu0 %v3184_v23  ;;  %2678 = vmatpush3.bf16.msra.mxu1 %v3203_v32 }
 0x4a4   :  { %2680 = vmatprep.subr.bf16.mxu0 %v3111_v9  ;;  %2711 = vmatprep.subr.bf16.mxu1 %v3032_v40 }
 0x559   :  { %v1171_v48 = vpop.f32.mrb[8].mxu0  ;;  %v1242_v19 = vpop.f32.mrb[16].mxu1 }
 0x55a   :  { %v2808_v21 = vadd.f32 %v3261_v11, %v1171_v48  ;;  %v1173_v22 = vpop.f32.mrb[9].mxu0  ;;  %v2173_v27 = vpop.f32.mrb[17].mxu1  ;;  %v1243_v47 = vadd.f32 %v1242_v19, %v3267_v36 }
 0x55b   :  { %v2810_v30 = vadd.f32 %v3263_v14, %v1173_v22 }
 0x55c   :  { %v1787_v28 = vmul.f32 -1.442695, %v2808_v21 }
 0x55d   :  { %v1788_v31 = vmul.f32 -1.442695, %v2810_v30 }
 0x55e   :  { %2890 = vpow2.f32 %v1787_v28 }
 0x55f   :  { %2892 = vpow2.f32 %v1788_v31 }
 0x568   :  { %v2891_v33 = vpop.eup %2890 }
 0x569   :  { %v1250_v50 = vadd.f32 1.0, %v2891_v33  ;;  %v2893_v38 = vpop.eup %2892 }
 0x56a   :  { %v1257_v42 = vadd.f32 1.0, %v2893_v38 }
 0x56b   :  { %2894 = vrcp.f32 %v1250_v50 }
 0x56c   :  { %2896 = vrcp.f32 %v1257_v42 }
 0x575   :  { %v2895_v49 = vpop.eup %2894 }
 0x576   :  { %v1260_v52 = vmul.f32 %v2895_v49, %v1243_v47  ;;  %v2897_v58 = vpop.eup %2896 }
 0x577   :  { %v1263_v43 = vsub.f32 1.0, %v2897_v58  ;;  %v1265_v1 = vmul.f32 %v2897_v58, %v1101_v16 }
 0x578   :  { %v1261_v54 = vadd.f32 %v1260_v52, %v3252_v57 }
 0x57a   :  { %2898 = vtanh.f32 %v1261_v54 }
 0x584   :  { %v2899_v60 = vpop.eup %2898 }
 0x585   :  { %v1264_v63 = vmul.f32 %v2899_v60, %v1263_v43 }
 0x587   :  { %v1266_v5 = vadd.f32 %v1265_v1, %v1264_v63 }
 0x589   :  { %1335 = vmatmul.mubr.f32.vlgmr.msra.gmra.mrb[10].mxu0 %v1266_v5  ;;  %2207 = vmatmul.mubr.f32.vlgmr.msra.gmra.mrb[18].mxu1 %v1266_v5 }
 0x58a   :  { %2682 = vmatpush1.bf16.msra.mxu0 %v3113_v17  ;;  %2713 = vmatpush3.bf16.msra.mxu1 %v3134_v41 }
 0x58b   :  { %2684 = vmatprep.subr.bf16.mxu0 %v3116_v18  ;;  %2714 = vmatprep.subr.bf16.mxu1 %v3032_v40 }
 0x58c   :  { %1499 = vmatprep.mubr.f32.mxu0 %v3031_v0  ;;  %2241 = vmatprep.mubr.msk.f32.mxu1 %vm3033_vm0, %v3031_v0 }
 0x58e   :  { %2686 = vmatpush1.bf16.msra.mxu0 %v3121_v25  ;;  %2716 = vmatpush3.bf16.msra.mxu1 %v3144_v51 }
 0x58f   :  { %2688 = vmatprep.subr.bf16.mxu0 %v3124_v26  ;;  %2717 = vmatprep.subr.bf16.mxu1 %v3032_v40 }
 0x592   :  { %2690 = vmatpush1.bf16.msra.mxu0 %v3128_v34  ;;  %2719 = vmatpush3.bf16.msra.mxu1 %v3155_v61 }
 0x593   :  { %2692 = vmatprep.subr.bf16.mxu0 %v3131_v35  ;;  %2720 = vmatprep.subr.bf16.mxu1 %v3032_v40 }
 0x596   :  { %2694 = vmatpush1.bf16.msra.mxu0 %v3138_v45  ;;  %2722 = vmatpush3.bf16.msra.mxu1 %v3166_v10 }
 0x597   :  { %2696 = vmatprep.subr.bf16.mxu0 %v3141_v46  ;;  %2723 = vmatprep.subr.bf16.mxu1 %v3032_v40 }
 0x59a   :  { %2698 = vmatpush1.bf16.msra.mxu0 %v3149_v55  ;;  %2725 = vmatpush3.bf16.msra.mxu1 %v3177_v20 }
 0x59b   :  { %2700 = vmatprep.subr.bf16.mxu0 %v3152_v56  ;;  %2726 = vmatprep.subr.bf16.mxu1 %v3032_v40 }
 0x59e   :  { %2702 = vmatpush1.bf16.msra.mxu0 %v3160_v2  ;;  %2728 = vmatpush3.bf16.msra.mxu1 %v3188_v24 }
 0x59f   :  { %2704 = vmatprep.subr.bf16.mxu0 %v3163_v4  ;;  %2729 = vmatprep.subr.bf16.mxu1 %v3032_v40 }
 0x5a2   :  { %2706 = vmatpush1.bf16.msra.mxu0 %v3171_v13  ;;  %2731 = vmatpush3.bf16.msra.mxu1 %v3195_v29 }
 0x5a3   :  { %2708 = vmatprep.subr.bf16.mxu0 %v3174_v15  ;;  %2732 = vmatprep.subr.bf16.mxu1 %v3032_v40 }
 0x5a6   :  { %2710 = vmatpush1.bf16.msra.mxu0 %v3184_v23  ;;  %2734 = vmatpush3.bf16.msra.mxu1 %v3203_v32 }
 0x5a7   :  { %2736 = vmatprep.subr.bf16.mxu0 %v3111_v9  ;;  %2767 = vmatprep.subr.bf16.mxu1 %v3032_v40 }
 0x65c   :  { %v1336_v57 = vpop.f32.mrb[10].mxu0  ;;  %v1407_v6 = vpop.f32.mrb[18].mxu1 }
 0x65d   :  { %v2812_v7 = vadd.f32 %v3261_v11, %v1336_v57  ;;  %v1338_v37 = vpop.f32.mrb[11].mxu0  ;;  %v2208_v39 = vpop.f32.mrb[19].mxu1  ;;  %v1408_v9 = vadd.f32 %v1407_v6, %v3267_v36 }
 0x65e   :  { %v2814_v59 = vadd.f32 %v3263_v14, %v1338_v37 }
 0x65f   :  { %v1789_v44 = vmul.f32 -1.442695, %v2812_v7 }
 0x660   :  { %v1790_v8 = vmul.f32 -1.442695, %v2814_v59 }
 0x661   :  { %2900 = vpow2.f32 %v1789_v44 }
 0x662   :  { %2902 = vpow2.f32 %v1790_v8 }
 0x66b   :  { %v2901_v12 = vpop.eup %2900 }
 0x66c   :  { %v1415_v16 = vadd.f32 1.0, %v2901_v12  ;;  %v2903_v48 = vpop.eup %2902 }
 0x66d   :  { %v1422_v19 = vadd.f32 1.0, %v2903_v48 }
 0x66e   :  { %2904 = vrcp.f32 %v1415_v16 }
 0x66f   :  { %2906 = vrcp.f32 %v1422_v19 }
 0x678   :  { %v2905_v21 = vpop.eup %2904 }
 0x679   :  { %v1425_v22 = vmul.f32 %v2905_v21, %v1408_v9  ;;  %v2907_v28 = vpop.eup %2906 }
 0x67a   :  { %v1428_v30 = vsub.f32 1.0, %v2907_v28  ;;  %v1430_v50 = vmul.f32 %v2907_v28, %v1266_v5 }
 0x67b   :  { %v1426_v27 = vadd.f32 %v1425_v22, %v3250_v53 }
 0x67d   :  { %2908 = vtanh.f32 %v1426_v27 }
 0x687   :  { %v2909_v31 = vpop.eup %2908 }
 0x688   :  { %v1429_v33 = vmul.f32 %v2909_v31, %v1428_v30 }
 0x68a   :  { %v1431_v38 = vadd.f32 %v1430_v50, %v1429_v33 }
 0x68c   :  { %1500 = vmatmul.mubr.f32.vlgmr.msra.gmra.mrb[12].mxu0 %v1431_v38  ;;  %2242 = vmatmul.mubr.f32.vlgmr.msra.gmra.mrb[20].mxu1 %v1431_v38 }
 0x68d   :  { %2738 = vmatpush1.bf16.msra.mxu0 %v3113_v17  ;;  %2769 = vmatpush3.bf16.msra.mxu1 %v3134_v41 }
 0x68e   :  { %2740 = vmatprep.subr.bf16.mxu0 %v3116_v18  ;;  %2770 = vmatprep.subr.bf16.mxu1 %v3032_v40 }
 0x68f   :  { %1664 = vmatprep.mubr.f32.mxu0 %v3031_v0  ;;  %2276 = vmatprep.mubr.msk.f32.mxu1 %vm3033_vm0, %v3031_v0 }
 0x691   :  { %2742 = vmatpush1.bf16.msra.mxu0 %v3121_v25  ;;  %2772 = vmatpush3.bf16.msra.mxu1 %v3144_v51 }
 0x692   :  { %2744 = vmatprep.subr.bf16.mxu0 %v3124_v26  ;;  %2773 = vmatprep.subr.bf16.mxu1 %v3032_v40 }
 0x695   :  { %2746 = vmatpush1.bf16.msra.mxu0 %v3128_v34  ;;  %2775 = vmatpush3.bf16.msra.mxu1 %v3155_v61 }
 0x696   :  { %2748 = vmatprep.subr.bf16.mxu0 %v3131_v35  ;;  %2776 = vmatprep.subr.bf16.mxu1 %v3032_v40 }
 0x699   :  { %2750 = vmatpush1.bf16.msra.mxu0 %v3138_v45  ;;  %2778 = vmatpush3.bf16.msra.mxu1 %v3166_v10 }
 0x69a   :  { %2752 = vmatprep.subr.bf16.mxu0 %v3141_v46  ;;  %2779 = vmatprep.subr.bf16.mxu1 %v3032_v40 }
 0x69d   :  { %2754 = vmatpush1.bf16.msra.mxu0 %v3149_v55  ;;  %2781 = vmatpush3.bf16.msra.mxu1 %v3177_v20 }
 0x69e   :  { %2756 = vmatprep.subr.bf16.mxu0 %v3152_v56  ;;  %2782 = vmatprep.subr.bf16.mxu1 %v3032_v40 }
 0x6a1   :  { %2758 = vmatpush1.bf16.msra.mxu0 %v3160_v2  ;;  %2784 = vmatpush3.bf16.msra.mxu1 %v3188_v24 }
 0x6a2   :  { %2760 = vmatprep.subr.bf16.mxu0 %v3163_v4  ;;  %2785 = vmatprep.subr.bf16.mxu1 %v3032_v40 }
 0x6a5   :  { %2762 = vmatpush1.bf16.msra.mxu0 %v3171_v13  ;;  %2787 = vmatpush3.bf16.msra.mxu1 %v3195_v29 }
 0x6a6   :  { %2764 = vmatprep.subr.bf16.mxu0 %v3174_v15  ;;  %2788 = vmatprep.subr.bf16.mxu1 %v3032_v40 }
 0x6a9   :  { %2766 = vmatpush1.bf16.msra.mxu0 %v3184_v23  ;;  %2790 = vmatpush3.bf16.msra.mxu1 %v3203_v32 }
 0x75f   :  { %v1501_v0 = vpop.f32.mrb[12].mxu0  ;;  %v1572_v17 = vpop.f32.mrb[20].mxu1 }
 0x760   :  { %v2816_v18 = vadd.f32 %v3261_v11, %v1501_v0  ;;  %v1503_v25 = vpop.f32.mrb[13].mxu0  ;;  %v2243_v26 = vpop.f32.mrb[21].mxu1  ;;  %v1573_v55 = vadd.f32 %v1572_v17, %v3267_v36 }
 0x761   :  { %v2818_v35 = vadd.f32 %v3263_v14, %v1503_v25 }
 0x762   :  { %v1791_v34 = vmul.f32 -1.442695, %v2816_v18 }
 0x763   :  { %v1792_v41 = vmul.f32 -1.442695, %v2818_v35 }
 0x764   :  { %2910 = vpow2.f32 %v1791_v34 }
 0x765   :  { %2912 = vpow2.f32 %v1792_v41 }
 0x76e   :  { %v2911_v45 = vpop.eup %2910 }
 0x76f   :  { %v1580_v46 = vadd.f32 1.0, %v2911_v45  ;;  %v2913_v40 = vpop.eup %2912 }
 0x770   :  { %v1587_v51 = vadd.f32 1.0, %v2913_v40 }
 0x771   :  { %2914 = vrcp.f32 %v1580_v46 }
 0x772   :  { %2916 = vrcp.f32 %v1587_v51 }
 0x77b   :  { %v2915_v56 = vpop.eup %2914 }
 0x77c   :  { %v1590_v61 = vmul.f32 %v2915_v56, %v1573_v55  ;;  %v2917_v4 = vpop.eup %2916 }
 0x77d   :  { %v1593_v10 = vsub.f32 1.0, %v2917_v4  ;;  %v1595_v20 = vmul.f32 %v2917_v4, %v1431_v38 }
 0x77e   :  { %v1591_v2 = vadd.f32 %v1590_v61, %v3259_v3 }
 0x780   :  { %2918 = vtanh.f32 %v1591_v2 }
 0x78a   :  { %v2919_v13 = vpop.eup %2918 }
 0x78b   :  { %v1594_v15 = vmul.f32 %v2919_v13, %v1593_v10 }
 0x78d   :  { %v1596_v23 = vadd.f32 %v1595_v20, %v1594_v15 }
 0x78f   :  { %1665 = vmatmul.mubr.f32.vlgmr.msra.gmra.mrb[14].mxu0 %v1596_v23  ;;  %2277 = vmatmul.mubr.f32.vlgmr.msra.gmra.mrb[22].mxu1 %v1596_v23 }
 0x862   :  { %v1666_v24 = vpop.f32.mrb[14].mxu0  ;;  %v1737_v29 = vpop.f32.mrb[22].mxu1 }
 0x863   :  { %v2820_v32 = vadd.f32 %v3261_v11, %v1666_v24  ;;  %v1668_v53 = vpop.f32.mrb[15].mxu0  ;;  %v2278_v42 = vpop.f32.mrb[23].mxu1  ;;  %v1738_v60 = vadd.f32 %v1737_v29, %v3267_v36 }
 0x864   :  { %v2822_v49 = vadd.f32 %v3263_v14, %v1668_v53 }
 0x865   :  { %v1793_v47 = vmul.f32 -1.442695, %v2820_v32 }
 0x866   :  { %v1794_v3 = vmul.f32 -1.442695, %v2822_v49 }
 0x867   :  { %2920 = vpow2.f32 %v1793_v47 }
 0x868   :  { %2922 = vpow2.f32 %v1794_v3 }
 0x871   :  { %v2921_v52 = vpop.eup %2920 }
 0x872   :  { %v1745_v54 = vadd.f32 1.0, %v2921_v52  ;;  %v2923_v58 = vpop.eup %2922 }
 0x873   :  { %v1752_v43 = vadd.f32 1.0, %v2923_v58 }
 0x874   :  { %2924 = vrcp.f32 %v1745_v54 }
 0x875   :  { %2926 = vrcp.f32 %v1752_v43 }
 0x87e   :  { %v2925_v63 = vpop.eup %2924 }
 0x87f   :  { %v1755_v1 = vmul.f32 %v2925_v63, %v1738_v60  ;;  %v2927_v5 = vpop.eup %2926 }
 0x880   :  { %v1758_v57 = vsub.f32 1.0, %v2927_v5  ;;  %v1760_v7 = vmul.f32 %v2927_v5, %v1596_v23 }
 0x881   :  { %v1756_v11 = vadd.f32 %v1755_v1, %v3257_v62 }
 0x883   :  { %2928 = vtanh.f32 %v1756_v11 }
 0x88d   :  { %v2929_v6 = vpop.eup %2928 }
 0x88e   :  { %v1759_v14 = vmul.f32 %v2929_v6, %v1758_v57 }
 0x890   :  { %v1761_v37 = vadd.f32 %v1760_v7, %v1759_v14 }
 0x892   :  { %1762 = vst [vmem:[#allocation9] sm:$0xff] %v1761_v37 }
 0x893   :  { %3007 = shalt.err (!%p3004_p0)
}
 0x894   :  { %s3008_s12 = scalar_lea.hbm %s3523_s5, 128 }
 0x895   :  { %p3009_p1 = scmp.ne.s32.totalorder %s3523_s5, %s3008_s12  ;;  %p3012_p2 = scmp.lt.u32.totalorder %s3008_s12, %s3523_s5 }
 0x897   :  { %p3014_p3 = pnand %p3012_p2, %p3009_p1 }
 0x899   :  { %3017 = shalt.err (!%p3014_p3)
}
 0x89a   :  { %1772 = dma.vmem_to_hbm [thread:$0]  %s1770_s8, 128, %s3523_s5, [#allocation5]  }
 0x89b   :  { %3022 = dma.done.wait [#allocation5], 128  }
 0x89c   :  { %3023 = vsyncadd [#allocation5], 4294967168 }
 0x89d   :  { %1776 = vsyncpa [#allocation4], 1 }
 0x89e   :  { %1777 = vsyncpa [#allocation7], 1 }
 0x89f   :  { %1778 = vsyncpa [#allocation5], 1 }

</bundles_post_ra>
